<compile_context>
chip_gen: v6e
topology: v6e:2x2x1
jax: 0.10.0
libtpu: 0.0.40
codegen_flags: <defaults>
</compile_context>

<pallas_src>
import functools

import numpy as np
import jax
import jax.numpy as jnp
from jax import lax
from jax.experimental import pallas as pl
from jax.experimental.pallas import tpu as pltpu


def _round_robin_perms(n_dim):
    """Brent-Luk round-robin Jacobi schedule as permutation matrices.

    Returns float32 [num_steps, N, N] with perms[t, j, partner_t(j)] = 1.
    Every unordered pair (p, q) appears in exactly one step; pairs within a
    step are disjoint, so all N//2 rotations of a step commute and can be
    applied as one orthogonal similarity.  Odd N gets a bye (all-zero row).
    """
    m = n_dim if n_dim % 2 == 0 else n_dim + 1
    players = list(range(m))
    perms = np.zeros((m - 1, n_dim, n_dim), dtype=np.float32)
    for t in range(m - 1):
        for i in range(m // 2):
            a, b = players[i], players[m - 1 - i]
            if a < n_dim and b < n_dim:
                perms[t, a, b] = 1.0
                perms[t, b, a] = 1.0
        players = [players[0]] + [players[-1]] + players[1:-1]
    return perms


# TODO(synk): torch.linalg.eigvals is a general complex eigensolver with
# backend-defined eigenvalue ordering; there is no Pallas/TPU equivalent.  We
# assume (near-)symmetric real inputs (Hi-C maps), compute the real spectrum
# with parallel cyclic Jacobi, and return it in descending order.
def _jacobi_eigvals_kernel(perm_ref, mat_ref, eig_ref, a_ref, *, n_sweeps):
    """Eigenvalues (descending) of one symmetric [N,N] matrix."""
    N = mat_ref.shape[-1]
    num_steps = perm_ref.shape[0]

    iota_r = lax.broadcasted_iota(jnp.int32, (N, N), 0)   # sublane (row) index
    iota_c = lax.broadcasted_iota(jnp.int32, (N, N), 1)   # lane (col) index
    eye = (iota_r == iota_c).astype(jnp.float32)

    # Stage the (already symmetrized) matrix in VMEM scratch.
    a_ref[...] = mat_ref[0]

    def step_body(t, carry):
        a = a_ref[...]
        perm = perm_ref[t]                                 # [N,N] pairing

        # Per-row rotation parameters, fully vectorised over all N/2 pairs.
        d_col = jnp.sum(a * eye, axis=1, keepdims=True)    # [N,1]  a[j,j]
        d_row = jnp.sum(a * eye, axis=0, keepdims=True)    # [1,N]
        d_par = jnp.sum(perm * d_row, axis=1, keepdims=True)   # a[pj,pj]
        off = jnp.sum(a * perm, axis=1, keepdims=True)     # a[j,pj]

        # Rotation angle (Golub & Van Loan) that zeroes a[p,q] for every pair.
        abs_off = jnp.abs(off)
        denom = jnp.where(abs_off > 0.0, 2.0 * off, 1.0)
        tau = (d_par - d_col) / denom
        tan = jnp.where(tau >= 0.0, 1.0, -1.0) / (
            jnp.abs(tau) + jnp.sqrt(1.0 + tau * tau))
        tan = jnp.where(abs_off > 1e-30, tan, 0.0)         # bye / converged
        c = lax.rsqrt(1.0 + tan * tan)                     # EUP slot
        s = tan * c

        # J[j,j] = c_j ; J[j, partner(j)] = s_j.  The per-index formula flips
        # the sign of s at the partner row, which is exactly the Givens J with
        # J[p,q] = +s, J[q,p] = -s; J^T needs no transpose (diag - offdiag).
        diag = eye * c
        offm = perm * s
        j_mat = diag + offm
        jt_mat = diag - offm

        # A <- J^T A J : all N/2 disjoint rotations at once, on the MXU.
        a_ref[...] = jnp.dot(
            jt_mat,
            jnp.dot(a, j_mat, preferred_element_type=jnp.float32),
            preferred_element_type=jnp.float32)
        return carry

    def sweep_body(_, carry):
        return lax.fori_loop(0, num_steps, step_body, carry)

    lax.fori_loop(0, n_sweeps, sweep_body, 0)

    # Extract the (now essentially diagonal) spectrum and sort it descending
    # with a rank / one-hot selection (no in-kernel gather needed).
    a = a_ref[...]
    diag_col = jnp.sum(a * eye, axis=1, keepdims=True)     # [N,1]  e_j on rows
    diag_row = jnp.sum(a * eye, axis=0, keepdims=True)     # [1,N]  e_k on lanes
    bigger = diag_row > diag_col
    ties = jnp.logical_and(diag_row == diag_col, iota_c < iota_r)
    rank = jnp.sum(jnp.logical_or(bigger, ties).astype(jnp.float32),
                   axis=1, keepdims=True)                  # [N,1], 0 = largest
    sel = (rank == iota_c.astype(jnp.float32)).astype(jnp.float32)
    sorted_row = jnp.sum(sel * diag_col, axis=0, keepdims=True)   # [1,N] desc.
    eig_ref[...] = sorted_row.reshape(1, 1, N)


def _dist_kernel(eig_ref, out_ref, *, top_n):
    """|| e_out[:n] - e_tgt[:n] ||_2 over the two sorted spectra."""
    e = eig_ref[...]                                       # [2,1,N]
    n_lanes = e.shape[-1]
    lane = lax.broadcasted_iota(jnp.int32, (1, n_lanes), 1)
    mask = (lane < top_n).astype(jnp.float32)
    d = (e[0] - e[1]) * mask
    out_ref[...] = jnp.sqrt(jnp.sum(d * d, axis=1, keepdims=True))


def spectral_loss(outputs, targets, n=10, *, sweeps=15):
    """Pallas forward pass of GrapHiC SpectralLoss (symmetric real inputs)."""
    N = outputs.shape[-1]
    assert outputs.shape == (N, N) and targets.shape == (N, N)

    mats = jnp.stack([outputs, targets]).astype(jnp.float32)       # [2,N,N]
    # Eigenvalues of a symmetric matrix are real; symmetrize defensively (glue).
    mats = 0.5 * (mats + jnp.swapaxes(mats, -1, -2))

    perms = jnp.asarray(_round_robin_perms(N))                      # [steps,N,N]
    num_steps = perms.shape[0]

    eig_kernel = functools.partial(_jacobi_eigvals_kernel, n_sweeps=int(sweeps))
    eigs = pl.pallas_call(
        eig_kernel,
        out_shape=jax.ShapeDtypeStruct((2, 1, N), jnp.float32),
        grid_spec=pltpu.PrefetchScalarGridSpec(
            num_scalar_prefetch=0,
            grid=(2,),                                     # outputs / targets
            in_specs=[pl.BlockSpec((num_steps, N, N), lambda i: (0, 0, 0)),
                      pl.BlockSpec((1, N, N), lambda i: (i, 0, 0))],
            out_specs=pl.BlockSpec((1, 1, N), lambda i: (i, 0, 0)),
            scratch_shapes=[pltpu.VMEM((N, N), jnp.float32)],
        ),
        compiler_params=pltpu.CompilerParams(
            dimension_semantics=("parallel",)),            # 2 TCs on v7x
    )(perms, mats)

    dist_kernel = functools.partial(_dist_kernel, top_n=int(n))
    loss = pl.pallas_call(
        dist_kernel,
        out_shape=jax.ShapeDtypeStruct((1, 1), jnp.float32),
        in_specs=[pl.BlockSpec(memory_space=pltpu.MemorySpace.VMEM)],
        out_specs=pl.BlockSpec(memory_space=pltpu.MemorySpace.VMEM),
    )(eigs)
    return loss[0, 0]


if __name__ == "__main__":
    key = jax.random.PRNGKey(0)
    k1, k2 = jax.random.split(key)
    N, n = 64, 10

    a = jax.random.normal(k1, (N, N), jnp.float32)
    b = jax.random.normal(k2, (N, N), jnp.float32)
    outputs = 0.5 * (a + a.T)          # symmetric "predicted" Hi-C map
    targets = 0.5 * (b + b.T)          # symmetric "target" Hi-C map

    loss = spectral_loss(outputs, targets, n=n)
    loss = jax.block_until_ready(loss)

    # Reference: descending eigenvalues of each symmetric map, 2-norm of diff.
    ev_o = jnp.linalg.eigvalsh(outputs)[::-1]
    ev_t = jnp.linalg.eigvalsh(targets)[::-1]
    ref = jnp.sqrt(jnp.sum((ev_o[:n] - ev_t[:n]) ** 2))

    assert abs(float(loss) - float(ref)) < 1e-3 * max(1.0, abs(float(ref))), (
        float(loss), float(ref))
    print("KERNEL_OK")
</pallas_src>

<mosaic_0001>
module attributes {stable_mosaic.version = 11 : i64} {
  func.func @_jacobi_eigvals_kernel(%arg0: i32, %arg1: memref<63x64x64xf32, #tpu.memory_space<vmem>>, %arg2: memref<1x64x64xf32, #tpu.memory_space<vmem>>, %arg3: memref<1x1x64xf32, #tpu.memory_space<vmem>>, %arg4: memref<64x64xf32, #tpu.memory_space<vmem>>) attributes {dimension_semantics = [#tpu.dimension_semantics<parallel>], iteration_bounds = array<i64: 2>, scalar_prefetch = 0 : i64, scratch_operands = 1 : i64, tpu.core_type = #tpu.core_type<tc>, window_params = [{pipeline_mode = #tpu.pipeline_mode<synchronous>, transform_indices = @transform_0, window_bounds = array<i64: 63, 64, 64>}, {transform_indices = @transform_1, window_bounds = array<i64: 1, 64, 64>}, {transform_indices = @transform_2, window_bounds = array<i64: 1, 1, 64>}]} {
    %0 = tpu.iota {dimensions = array<i32: 0>} : vector<64x64xi32>
    %1 = tpu.iota {dimensions = array<i32: 1>} : vector<64x64xi32>
    %2 = arith.cmpi eq, %0, %1 : vector<64x64xi32>
    %3 = arith.extui %2 : vector<64x64xi1> to vector<64x64xi32>
    %4 = arith.sitofp %3 : vector<64x64xi32> to vector<64x64xf32>
    %c0 = arith.constant 0 : index
    %c0_0 = arith.constant 0 : index
    %c0_1 = arith.constant 0 : index
    %5 = vector.load %arg2[%c0, %c0_0, %c0_1] : memref<1x64x64xf32, #tpu.memory_space<vmem>>, vector<1x64x64xf32>
    %6 = vector.shape_cast %5 : vector<1x64x64xf32> to vector<64x64xf32>
    %c0_2 = arith.constant 0 : index
    %c0_3 = arith.constant 0 : index
    %7 = vector.load %arg4[%c0_2, %c0_3] : memref<64x64xf32, #tpu.memory_space<vmem>>, vector<64x64xf32>
    tpu.vector_store %arg4[%c0_2, %c0_3], %6 {strides = array<i32>} : memref<64x64xf32, #tpu.memory_space<vmem>>, vector<64x64xf32>,
    %c0_i32 = arith.constant 0 : i32
    %c15_i32 = arith.constant 15 : i32
    %8 = arith.addi %c0_i32, %c15_i32 : i32
    %c1_i32 = arith.constant 1 : i32
    scf.for %arg5 = %c0_i32 to %8 step %c1_i32  : i32 {
      %c0_i32_12 = arith.constant 0 : i32
      %c63_i32 = arith.constant 63 : i32
      %40 = arith.addi %c0_i32_12, %c63_i32 : i32
      %c1_i32_13 = arith.constant 1 : i32
      scf.for %arg6 = %c0_i32_12 to %40 step %c1_i32_13  : i32 {
        %c0_15 = arith.constant 0 : index
        %c0_16 = arith.constant 0 : index
        %41 = vector.load %arg4[%c0_15, %c0_16] : memref<64x64xf32, #tpu.memory_space<vmem>>, vector<64x64xf32>
        %42 = arith.index_cast %arg6 : i32 to index
        %c0_17 = arith.constant 0 : index
        %c0_18 = arith.constant 0 : index
        %43 = vector.load %arg1[%42, %c0_17, %c0_18] : memref<63x64x64xf32, #tpu.memory_space<vmem>>, vector<1x64x64xf32>
        %44 = vector.shape_cast %43 : vector<1x64x64xf32> to vector<64x64xf32>
        %45 = arith.mulf %41, %4 : vector<64x64xf32>
        %cst_19 = arith.constant dense<0.000000e+00> : vector<64xf32>
        %46 = vector.multi_reduction <add>, %45, %cst_19 [1] : vector<64x64xf32> to vector<64xf32>
        %47 = vector.shape_cast %46 : vector<64xf32> to vector<64x1xf32>
        %48 = arith.mulf %41, %4 : vector<64x64xf32>
        %cst_20 = arith.constant dense<0.000000e+00> : vector<64xf32>
        %49 = vector.multi_reduction <add>, %48, %cst_20 [0] : vector<64x64xf32> to vector<64xf32>
        %50 = vector.shape_cast %49 : vector<64xf32> to vector<1x64xf32>
        %51 = vector.broadcast %50 : vector<1x64xf32> to vector<64x64xf32>
        %52 = arith.mulf %44, %51 : vector<64x64xf32>
        %cst_21 = arith.constant dense<0.000000e+00> : vector<64xf32>
        %53 = vector.multi_reduction <add>, %52, %cst_21 [1] : vector<64x64xf32> to vector<64xf32>
        %54 = vector.shape_cast %53 : vector<64xf32> to vector<64x1xf32>
        %55 = arith.mulf %41, %44 : vector<64x64xf32>
        %cst_22 = arith.constant dense<0.000000e+00> : vector<64xf32>
        %56 = vector.multi_reduction <add>, %55, %cst_22 [1] : vector<64x64xf32> to vector<64xf32>
        %57 = vector.shape_cast %56 : vector<64xf32> to vector<64x1xf32>
        %58 = math.absf %57 : vector<64x1xf32>
        %cst_23 = arith.constant 0.000000e+00 : f32
        %59 = vector.broadcast %cst_23 : f32 to vector<64x1xf32>
        %60 = arith.cmpf ogt, %58, %59 : vector<64x1xf32>
        %cst_24 = arith.constant 2.000000e+00 : f32
        %61 = vector.broadcast %cst_24 : f32 to vector<64x1xf32>
        %62 = arith.mulf %61, %57 : vector<64x1xf32>
        %cst_25 = arith.constant 1.000000e+00 : f32
        %63 = vector.broadcast %cst_25 : f32 to vector<64x1xf32>
        %64 = arith.select %60, %62, %63 : vector<64x1xi1>, vector<64x1xf32>
        %65 = arith.subf %54, %47 : vector<64x1xf32>
        %66 = arith.divf %65, %64 : vector<64x1xf32>
        %cst_26 = arith.constant 0.000000e+00 : f32
        %67 = vector.broadcast %cst_26 : f32 to vector<64x1xf32>
        %68 = arith.cmpf oge, %66, %67 : vector<64x1xf32>
        %cst_27 = arith.constant 1.000000e+00 : f32
        %cst_28 = arith.constant -1.000000e+00 : f32
        %69 = vector.broadcast %cst_27 : f32 to vector<64x1xf32>
        %70 = vector.broadcast %cst_28 : f32 to vector<64x1xf32>
        %71 = arith.select %68, %69, %70 : vector<64x1xi1>, vector<64x1xf32>
        %72 = math.absf %66 : vector<64x1xf32>
        %73 = arith.mulf %66, %66 : vector<64x1xf32>
        %cst_29 = arith.constant 1.000000e+00 : f32
        %74 = vector.broadcast %cst_29 : f32 to vector<64x1xf32>
        %75 = arith.addf %74, %73 : vector<64x1xf32>
        %76 = math.sqrt %75 : vector<64x1xf32>
        %77 = arith.addf %72, %76 : vector<64x1xf32>
        %78 = arith.divf %71, %77 : vector<64x1xf32>
        %cst_30 = arith.constant 1.000000e-30 : f32
        %79 = vector.broadcast %cst_30 : f32 to vector<64x1xf32>
        %80 = arith.cmpf ogt, %58, %79 : vector<64x1xf32>
        %cst_31 = arith.constant 0.000000e+00 : f32
        %81 = vector.broadcast %cst_31 : f32 to vector<64x1xf32>
        %82 = arith.select %80, %78, %81 : vector<64x1xi1>, vector<64x1xf32>
        %83 = arith.mulf %82, %82 : vector<64x1xf32>
        %cst_32 = arith.constant 1.000000e+00 : f32
        %84 = vector.broadcast %cst_32 : f32 to vector<64x1xf32>
        %85 = arith.addf %84, %83 : vector<64x1xf32>
        %86 = math.rsqrt %85 : vector<64x1xf32>
        %87 = arith.mulf %82, %86 : vector<64x1xf32>
        %88 = vector.broadcast %86 : vector<64x1xf32> to vector<64x64xf32>
        %89 = arith.mulf %4, %88 : vector<64x64xf32>
        %90 = vector.broadcast %87 : vector<64x1xf32> to vector<64x64xf32>
        %91 = arith.mulf %44, %90 : vector<64x64xf32>
        %92 = arith.addf %89, %91 : vector<64x64xf32>
        %93 = arith.subf %89, %91 : vector<64x64xf32>
        %cst_33 = arith.constant dense<0.000000e+00> : vector<64x64xf32>
        %94 = tpu.matmul %41, %92, %cst_33 {dimension_numbers = #tpu.dot_dimension_numbers<[1], [0], [0], [1], [0, 0, 1, 1], [], []>} : vector<64x64xf32>, vector<64x64xf32>, vector<64x64xf32> -> vector<64x64xf32>
        %cst_34 = arith.constant dense<0.000000e+00> : vector<64x64xf32>
        %95 = tpu.matmul %93, %94, %cst_34 {dimension_numbers = #tpu.dot_dimension_numbers<[1], [0], [0], [1], [0, 0, 1, 1], [], []>} : vector<64x64xf32>, vector<64x64xf32>, vector<64x64xf32> -> vector<64x64xf32>
        %c0_35 = arith.constant 0 : index
        %c0_36 = arith.constant 0 : index
        %96 = vector.load %arg4[%c0_35, %c0_36] : memref<64x64xf32, #tpu.memory_space<vmem>>, vector<64x64xf32>
        tpu.vector_store %arg4[%c0_35, %c0_36], %95 {strides = array<i32>} : memref<64x64xf32, #tpu.memory_space<vmem>>, vector<64x64xf32>,
      }
      %c63_i32_14 = arith.constant 63 : i32
    }
    %c0_4 = arith.constant 0 : index
    %c0_5 = arith.constant 0 : index
    %9 = vector.load %arg4[%c0_4, %c0_5] : memref<64x64xf32, #tpu.memory_space<vmem>>, vector<64x64xf32>
    %10 = arith.mulf %9, %4 : vector<64x64xf32>
    %cst = arith.constant dense<0.000000e+00> : vector<64xf32>
    %11 = vector.multi_reduction <add>, %10, %cst [1] : vector<64x64xf32> to vector<64xf32>
    %12 = vector.shape_cast %11 : vector<64xf32> to vector<64x1xf32>
    %13 = arith.mulf %9, %4 : vector<64x64xf32>
    %cst_6 = arith.constant dense<0.000000e+00> : vector<64xf32>
    %14 = vector.multi_reduction <add>, %13, %cst_6 [0] : vector<64x64xf32> to vector<64xf32>
    %15 = vector.shape_cast %14 : vector<64xf32> to vector<1x64xf32>
    %16 = vector.broadcast %15 : vector<1x64xf32> to vector<64x64xf32>
    %17 = vector.broadcast %12 : vector<64x1xf32> to vector<64x64xf32>
    %18 = arith.cmpf ogt, %16, %17 : vector<64x64xf32>
    %19 = vector.broadcast %15 : vector<1x64xf32> to vector<64x64xf32>
    %20 = vector.broadcast %12 : vector<64x1xf32> to vector<64x64xf32>
    %21 = arith.cmpf oeq, %19, %20 : vector<64x64xf32>
    %22 = arith.cmpi slt, %1, %0 : vector<64x64xi32>
    %23 = arith.andi %21, %22 : vector<64x64xi1>
    %24 = arith.ori %18, %23 : vector<64x64xi1>
    %25 = arith.extui %24 : vector<64x64xi1> to vector<64x64xi32>
    %26 = arith.sitofp %25 : vector<64x64xi32> to vector<64x64xf32>
    %cst_7 = arith.constant dense<0.000000e+00> : vector<64xf32>
    %27 = vector.multi_reduction <add>, %26, %cst_7 [1] : vector<64x64xf32> to vector<64xf32>
    %28 = vector.shape_cast %27 : vector<64xf32> to vector<64x1xf32>
    %29 = arith.sitofp %1 : vector<64x64xi32> to vector<64x64xf32>
    %30 = vector.broadcast %28 : vector<64x1xf32> to vector<64x64xf32>
    %31 = arith.cmpf oeq, %30, %29 : vector<64x64xf32>
    %32 = arith.extui %31 : vector<64x64xi1> to vector<64x64xi32>
    %33 = arith.sitofp %32 : vector<64x64xi32> to vector<64x64xf32>
    %34 = vector.broadcast %12 : vector<64x1xf32> to vector<64x64xf32>
    %35 = arith.mulf %33, %34 : vector<64x64xf32>
    %cst_8 = arith.constant dense<0.000000e+00> : vector<64xf32>
    %36 = vector.multi_reduction <add>, %35, %cst_8 [0] : vector<64x64xf32> to vector<64xf32>
    %37 = vector.shape_cast %36 : vector<64xf32> to vector<1x64xf32>
    %38 = vector.shape_cast %37 : vector<1x64xf32> to vector<1x1x64xf32>
    %c0_9 = arith.constant 0 : index
    %c0_10 = arith.constant 0 : index
    %c0_11 = arith.constant 0 : index
    %39 = vector.load %arg3[%c0_9, %c0_10, %c0_11] : memref<1x1x64xf32, #tpu.memory_space<vmem>>, vector<1x1x64xf32>
    tpu.vector_store %arg3[%c0_9, %c0_10, %c0_11], %38 {strides = array<i32>} : memref<1x1x64xf32, #tpu.memory_space<vmem>>, vector<1x1x64xf32>,
    return
  }
  func.func @transform_0(%arg0: i32) -> (i32, i32, i32) {
    %c0_i32 = arith.constant 0 : i32
    %c0_i32_0 = arith.constant 0 : i32
    %c0_i32_1 = arith.constant 0 : i32
    %c0_i32_2 = arith.constant 0 : i32
    return %c0_i32, %c0_i32_0, %c0_i32_1 : i32, i32, i32
  }
  func.func @transform_1(%arg0: i32) -> (i32, i32, i32) {
    %c0_i32 = arith.constant 0 : i32
    %c0_i32_0 = arith.constant 0 : i32
    %c0_i32_1 = arith.constant 0 : i32
    return %arg0, %c0_i32, %c0_i32_0 : i32, i32, i32
  }
  func.func @transform_2(%arg0: i32) -> (i32, i32, i32) {
    %c0_i32 = arith.constant 0 : i32
    %c0_i32_0 = arith.constant 0 : i32
    %c0_i32_1 = arith.constant 0 : i32
    return %arg0, %c0_i32, %c0_i32_0 : i32, i32, i32
  }
}

</mosaic_0001>

<bundles_post_ra>
// kernel: tpu_custom_call.1
= control target key start
LH: loop header
LB: loop body
LE: loop exit
PB: predicated region body
PF: predicated region fallthrough
CT: control target
= control target key end

     0   :  { %7 = vsyncpa [#allocation4], 0  ;;  %s2409_s0 = inlined_call_operand.hbm [shape: f32[63,64,64], index: 0, kind: input, shape index: {}]   ;;  %s2410_s1 = inlined_call_operand.hbm [shape: f32[2,64,64], index: 1, kind: input, shape index: {}]   ;;  %s2411_s2 = inlined_call_operand.hbm [shape: f32[2,1,64], index: 2, kind: output, shape index: {}]  }
   0x1   :  { %8 = vsyncpa [#allocation7], 0 }
   0x2   :  { %10 = vsyncpa [#allocation7 + $0x1], 0 }
   0x3   :  { %11 = vsyncpa [#allocation5], 0 }
   0x4   :  { %13 = vsyncpa [#allocation5 + $0x1], 0  ;;  %s1627_s9 = smov 0   ;;  %s1629_s10 = smov 0  }
   0x5   :  { %s1631_s11 = smov 0   ;;  %s1633_s12 = smov 0  }
   0x6 LB: > { %s1648_s13 = sadd.s32 4294967295, %s1595_s12   ;;  %s1181_s14 = sadd.s32 4294967294, %s1595_s12   ;;  %s1595_s12 = sphi %s1633_s12, %s2468_s12   ;;  %s1591_s11 = sphi %s1631_s11, %s2467_s11   ;;  %s1587_s10 = sphi %s1629_s10, %s2466_s10   ;;  %s1583_s9 = sphi %s1627_s9, %s2465_s9  }
   0x7   : > { %p60_p0 = scmp.ne.s32.totalorder %s1587_s10, %s1583_s9  ;;  %p2412_p1 = scmp.eq.s32.totalorder %s1648_s13, 0 }
   0x8   : > { %p90_p3 = scmp.eq.s32.totalorder %s1181_s14, 1  ;;  %p1182_p5 = scmp.ge.s32.totalorder %s1595_s12, 1 }
   0x9   : > { %p1657_p4 = por %p2412_p1, %p60_p0  ;;  %p97_p7 = scmp.lt.s32.totalorder %s1595_s12, 3 }
   0xa   : > { %p1662_p6 = por %p90_p3, %p60_p0  ;;  %s1605_s18 = smov [#allocation3]  }
   0xb   : > { %s2430_s15 = scalar_select %p1657_p4, 1, 0 }
   0xc   : > { %s2431_s16 = scalar_select %p1662_p6, 1, 0 }
   0xd   : > { %p1667_p8 = pnand %p1182_p5, %p97_p7  ;;  %s109_s19 = sshll.u32 %s1605_s18, 4  ;;  %s110_s19 = int_to_ptr.vmem [resolvable:$true] %s109_s19 }
   0xe   : > { %s1681_s21 = sadd.s32 1, %s1595_s12   ;;  %s47_s22 = sadd.s32 1, %s1591_s11 }
   0xf   : > { %s2432_s17 = scalar_select %p1667_p8, 1, 0 }
  0x10   : > { %p1332_p9 = pneg %p1667_p8  ;;  %s44_s23 = ssub.s32 %s1595_s12, %s1681_s21 }
  0x11   : > { %s1476_s24 = scalar_lea.vmem %s110_s19, 64512  ;;  %p1484_p5 = scmp.lt.s32.totalorder %s110_s19, %s110_s19 }
  0x12   : > { %p1676_p11 = pnand %p1332_p9, %p2412_p1  ;;  %p1477_p13 = scmp.ne.s32.totalorder %s110_s19, %s1476_s24 }
  0x13   : > { %p1485_p7 = scmp.lt.s32.totalorder %s1476_s24, %s1476_s24 }
  0x14   : > { %p1467_p12 = pneg %p1676_p11 }
  0x15   : > { %p1486_p10 = por %p1485_p7, %p1484_p5 }
  0x16   : > { %p1479_p0 = pnand %p1477_p13, %p1467_p12 }
  0x18   : > { %p1480_p3 = pneg %p1479_p0 }
  0x1a   : > { %p1487_p2 = pnand %p1486_p10, %p1480_p3 }
  0x1c   : > { %1490 = shalt.err (!%p1487_p2)
}
  0x1d   : > { %s1606_s25 = smov 128   ;;  %s1607_s26 = smov 8  }
  0x1e   : > { %1335 = dma.hbm_to_vmem [thread:$0]  (!%p1676_p11), %s2409_s0, 64512, %s110_s19, [#allocation4], %s1606_s25, %s1606_s25, %s1607_s26  }
  0x1f   : > { %p45_p2 = scmp.eq.s32.totalorder %s44_s23, 0  ;;  %p54_p9 = scmp.ne.s32.totalorder %s1591_s11, %s1587_s10 }
  0x20   : > { %p55_p10 = scmp.eq.s32.totalorder %s1595_s12, 0  ;;  %p1345_p12 = scmp.lt.s32.totalorder %s1595_s12, 2 }
  0x21   : > { %s1701_s29 = scalar_select %p45_p2, %s1591_s11, %s47_s22  }
  0x22   : > { %p56_p13 = por %p55_p10, %p54_p9  ;;  %p2434_p0 = scmp.eq.s32.totalorder %s1648_s13, 1 }
  0x23   : > { %s123_s3 = sand.u32 1, %s1591_s11   ;;  %s1235_s4 = sshll.u32 %s1595_s12, 10 }
  0x24   : > { %p1705_p3 = por %p2434_p0, %p54_p9  ;;  %s1185_s5 = sshll.u32 %s123_s3, 6 }
  0x25   : > { %s1714_s8 = scalar_lea.hbm %s2410_s1, %s1235_s4  ;;  %s127_s14 = scalar_lea.vmem [#allocation6], %s1185_s5 }
  0x26   : > { %s2435_s30 = scalar_select %p1705_p3, 1, 0 }
  0x27   : > { %s134_s18 = sshll.u32 %s127_s14, 4  ;;  %p1716_p11 = pnand %p1345_p12, %p56_p13  ;;  %s1720_s18 = int_to_ptr.vmem [resolvable:$true] %s134_s18 }
  0x28   : > { %s1722_s20 = scalar_lea.sflag [#allocation7], %s123_s3  ;;  %s1491_s22 = scalar_lea.hbm %s1714_s8, 1024 }
  0x29   : > { %p1492_p5 = scmp.ne.s32.totalorder %s1714_s8, %s1491_s22  ;;  %p1493_p7 = pneg %p1716_p11 }
  0x2a   : > { %s1496_s27 = scalar_lea.hbm %s2410_s1, 2048  ;;  %p1497_p10 = scmp.lt.s32.totalorder %s1714_s8, %s2410_s1 }
  0x2b   : > { %p1494_p2 = pnand %p1493_p7, %p1492_p5  ;;  %p1498_p12 = scmp.lt.s32.totalorder %s1496_s27, %s1491_s22 }
  0x2d   : > { %p1495_p9 = pneg %p1494_p2  ;;  %p1499_p13 = por %p1498_p12, %p1497_p10 }
  0x2f   : > { %p1500_p0 = pnand %p1499_p13, %p1495_p9 }
  0x31   : > { %1503 = shalt.err (!%p1500_p0)
}
  0x32   : > { %s1504_s3 = scalar_lea.vmem %s1720_s18, 1024  ;;  %s1608_s5 = smov [#allocation6]  }
  0x33   : > { %p1505_p1 = scmp.ne.s32.totalorder %s1720_s18, %s1504_s3  ;;  %s1509_s6 = sshll.u32 %s1608_s5, 4  ;;  %s1510_s6 = int_to_ptr.vmem [resolvable:$false] %s1509_s6 }
  0x34   : > { %s1511_s7 = scalar_lea.vmem %s1510_s6, 2048  ;;  %p1512_p2 = scmp.lt.s32.totalorder %s1720_s18, %s1510_s6 }
  0x35   : > { %p1507_p6 = pnand %p1505_p1, %p1493_p7  ;;  %p1513_p3 = scmp.lt.s32.totalorder %s1511_s7, %s1504_s3 }
  0x37   : > { %p1508_p5 = pneg %p1507_p6  ;;  %p1514_p4 = por %p1513_p3, %p1512_p2 }
  0x39   : > { %p1515_p8 = pnand %p1514_p4, %p1508_p5 }
  0x3b   : > { %1518 = shalt.err (!%p1515_p8)
}
  0x3c   : > { %1339 = dma.hbm_to_vmem [thread:$0]  (!%p1716_p11), %s1714_s8, 1024, %s1720_s18, %s1722_s20, %s1606_s25, %s1606_s25, %s1607_s26  }
  0x3d   : > { %p2437_p1 = scmp.ne.s32.totalorder %s2432_s17, 0 }
  0x3f   : > { %146 = sbr.rel (%p2437_p1) target bundleno = 1123 (0x463), region = 28 }
  0x44   : > { %p2438_p6 = scmp.eq.s32.totalorder %s1648_s13, 0 }
  0x46   : > { %1570 = dma.done.wait (%p2438_p6), [#allocation4], 64512   ;;  %p2439_p7 = pmov %p2438_p6 }
  0x47   : > { %s1753_s14 = sand.u32 1, %s1587_s10   ;;  %p2440_p4 = scmp.ne.s32.totalorder %s2430_s15, 0 }
  0x48   : > { %1572 = vsyncadd (%p2439_p7), [#allocation4], 4294902784  ;;  %s1190_s19 = sshll.u32 %s1753_s14, 6  ;;  %s153_s22 = scalar_lea.sflag [#allocation7], %s1753_s14 }
  0x49   : > { %s1757_s23 = scalar_lea.vmem [#allocation6], %s1190_s19 }
  0x4a   : > { %1574 = dma.done.wait (%p2440_p4), %s153_s22, 1024  }
  0x4b   : > { %1576 = vsyncadd (%p2440_p4), %s153_s22, 4294966272  ;;  %v176_v0 = vlaneseq  ;;  %vm219_vm0 = vcmask 523264   ;;  %v2416_v10 = vmov 0.0   ;;  %v211_v12 = vld [vmem:[%s1757_s23] sm:$0xff]  ;;  %v212_v13 = vld [vmem:[%s1757_s23 + $0x8] sm:$0xff]  ;;  %s175_s15 = scalar_lea.vmem [#allocation8], %s1753_s14 }
  0x4c   : > { %v213_v14 = vld [vmem:[%s1757_s23 + $0x10] sm:$0xff]  ;;  %220 = vst.msk [vmem:[#allocation2] sm:$0xff] %vm219_vm0, %v211_v12  ;;  %221 = vst.msk [vmem:[#allocation2 + $0x8] sm:$0xff] %vm219_vm0, %v212_v13  ;;  %v214_v19 = vld [vmem:[%s1757_s23 + $0x18] sm:$0xff]  ;;  %s1854_s17 = smov 0  }
  0x4d   : > { %v1763_v1 = vshrl.u32 %v176_v0, 7  ;;  %v1765_v2 = vand.u32 127, %v176_v0  ;;  %222 = vst.msk [vmem:[#allocation2 + $0x10] sm:$0xff] %vm219_vm0, %v213_v14  ;;  %v215_v20 = vld [vmem:[%s1757_s23 + $0x20] sm:$0xff]  ;;  %223 = vst.msk [vmem:[#allocation2 + $0x18] sm:$0xff] %vm219_vm0, %v214_v19  ;;  %v216_v24 = vld [vmem:[%s1757_s23 + $0x28] sm:$0xff] }
  0x4e   : > { %224 = vst.msk [vmem:[#allocation2 + $0x20] sm:$0xff] %vm219_vm0, %v215_v20  ;;  %v217_v25 = vld [vmem:[%s1757_s23 + $0x30] sm:$0xff]  ;;  %v218_v26 = vld [vmem:[%s1757_s23 + $0x38] sm:$0xff]  ;;  %225 = vst.msk [vmem:[#allocation2 + $0x28] sm:$0xff] %vm219_vm0, %v216_v24 }
  0x4f   : > { %v1768_v3 = vadd.s32 8, %v1763_v1  ;;  %v1771_v4 = vadd.s32 16, %v1763_v1  ;;  %v1774_v5 = vadd.s32 24, %v1763_v1  ;;  %v1777_v6 = vadd.s32 32, %v1763_v1  ;;  %226 = vst.msk [vmem:[#allocation2 + $0x30] sm:$0xff] %vm219_vm0, %v217_v25  ;;  %227 = vst.msk [vmem:[#allocation2 + $0x38] sm:$0xff] %vm219_vm0, %v218_v26 }
  0x50   : > { %v1780_v7 = vadd.s32 40, %v1763_v1  ;;  %v1783_v8 = vadd.s32 48, %v1763_v1  ;;  %v1786_v9 = vadd.s32 56, %v1763_v1  ;;  %vm187_vm1 = vcmp.eq.s32.totalorder %v1763_v1, %v1765_v2 }
  0x51   : > { %2441 = vst [vmem:[#allocation12_spill] sm:$0xff] %v1777_v6  ;;  %vm188_vm2 = vcmp.eq.s32.totalorder %v1768_v3, %v1765_v2  ;;  %vm189_vm3 = vcmp.eq.s32.totalorder %v1771_v4, %v1765_v2  ;;  %vm190_vm4 = vcmp.eq.s32.totalorder %v1774_v5, %v1765_v2  ;;  %vm191_vm5 = vcmp.eq.s32.totalorder %v1777_v6, %v1765_v2 }
  0x52   : > { %2442 = vst [vmem:[#allocation13_spill] sm:$0xff] %v1780_v7  ;;  %2443 = vst [vmem:[#allocation14_spill] sm:$0xff] %v1783_v8  ;;  %vm192_vm6 = vcmp.eq.s32.totalorder %v1780_v7, %v1765_v2  ;;  %vm193_vm7 = vcmp.eq.s32.totalorder %v1783_v8, %v1765_v2  ;;  %vm194_vm8 = vcmp.eq.s32.totalorder %v1786_v9, %v1765_v2  ;;  %v1805_v11 = vsel %vm187_vm1, 1.0, %v2416_v10 }
  0x53   : > { %2444 = vst [vmem:[#allocation15_spill] sm:$0xff] %v1786_v9  ;;  %v1811_v15 = vsel %vm188_vm2, 1.0, %v2416_v10  ;;  %v1814_v16 = vsel %vm189_vm3, 1.0, %v2416_v10  ;;  %v1817_v17 = vsel %vm190_vm4, 1.0, %v2416_v10  ;;  %v1820_v18 = vsel %vm191_vm5, 1.0, %v2416_v10 }
  0x54   : > { %v1831_v21 = vsel %vm192_vm6, 1.0, %v2416_v10  ;;  %v1837_v22 = vsel %vm193_vm7, 1.0, %v2416_v10  ;;  %v1843_v23 = vsel %vm194_vm8, 1.0, %v2416_v10 }
  0x55 LB: >> { %s1859_s25 = smov 0   ;;  %s1599_s17 = sphi %s1854_s17, %s233_s17  }
  0x56 LB: >>> { %v1864_v27 = vld [vmem:[#allocation2 + $0x18] sm:$0xff]  ;;  %v1866_v28 = vld [vmem:[#allocation2 + $0x10] sm:$0xff]  ;;  %s1199_s26 = sshll.u32 %s1603_s25, 6  ;;  %v1871_v30 = vld [vmem:[#allocation2 + $0x8] sm:$0xff]  ;;  %s239_s25 = sadd.s32 1, %s1603_s25   ;;  %s1603_s25 = sphi %s1859_s25, %s239_s25  }
  0x57   : >>> { %v1868_v29 = vld [vmem:[#allocation2 + $0x38] sm:$0xff]  ;;  %v240_v31 = vld [vmem:[#allocation2] sm:$0xff]  ;;  %v1873_v32 = vld [vmem:[#allocation2 + $0x28] sm:$0xff]  ;;  %v260_v35 = vmul.f32 %v1814_v16, %v1866_v28  ;;  %v259_v36 = vmul.f32 %v1811_v15, %v1871_v30  ;;  %s249_s8 = scalar_lea.vmem [#allocation3], %s1199_s26  ;;  %v261_v41 = vmul.f32 %v1817_v17, %v1864_v27  ;;  %p236_p8 = scmp.ge.s32.totalorder %s239_s25, 63  }
  0x58   : >>> { %v1875_v33 = vld [vmem:[#allocation2 + $0x30] sm:$0xff]  ;;  %v1877_v34 = vld [vmem:[#allocation2 + $0x20] sm:$0xff]  ;;  %v258_v37 = vmul.f32 %v1805_v11, %v240_v31  ;;  %1284 = vmatprep.mubr.msk.f32.mxu0 %vm219_vm0, %v240_v31  ;;  %v1885_v38 = vld [vmem:[%s249_s8 + $0x38] sm:$0xff]  ;;  %v263_v57 = vmul.f32 %v1831_v21, %v1873_v32  ;;  %v265_v14 = vmul.f32 %v1843_v23, %v1868_v29  ;;  %s233_s17 = sadd.s32 (%p236_p8), 1, %s1599_s17  }
  0x59   : >>> { %v1887_v39 = vld [vmem:[%s249_s8 + $0x28] sm:$0xff]  ;;  %v1889_v40 = vld [vmem:[%s249_s8 + $0x30] sm:$0xff]  ;;  %v342_v42 = vmul.f32 %v1885_v38, %v1868_v29  ;;  %v1899_v45 = vld [vmem:[%s249_s8 + $0x20] sm:$0xff]  ;;  %v1902_v46 = vsel %vm219_vm0, %v259_v36, 0.0  ;;  %v272_v53 = vsel %vm219_vm0, %v260_v35, 0.0  ;;  %v262_v54 = vmul.f32 %v1820_v18, %v1877_v34  ;;  %p230_p3 = scmp.ge.s32.totalorder (%p236_p8), %s233_s17, 15  }
  0x5a   : >>> { %v340_v43 = vmul.f32 %v1887_v39, %v1873_v32  ;;  %v341_v44 = vmul.f32 %v1889_v40, %v1875_v33  ;;  %v339_v47 = vmul.f32 %v1899_v45, %v1877_v34  ;;  %v1906_v48 = vld [vmem:[%s249_s8 + $0x18] sm:$0xff]  ;;  %v1908_v49 = vld [vmem:[%s249_s8 + $0x10] sm:$0xff]  ;;  %v1911_v50 = vsel %vm219_vm0, %v258_v37, 0.0  ;;  %v1929_v62 = vld [vmem:[%s249_s8 + $0x8] sm:$0xff] }
  0x5b   : >>> { %v364_v51 = vsel %vm219_vm0, %v342_v42, 0.0  ;;  %v275_v55 = vsel %vm219_vm0, %v261_v41, 0.0  ;;  %v290_v56 = vadd.f32 %v1902_v46, %v1911_v50  ;;  %v338_v60 = vmul.f32 %v1906_v48, %v1864_v27  ;;  %v1931_v63 = vld [vmem:[%s249_s8] sm:$0xff] }
  0x5c   : >>> { %v358_v52 = vsel %vm219_vm0, %v340_v43, 0.0  ;;  %365 = vadd.xlane.f32.xlu0 %v364_v51  ;;  %v361_v58 = vsel %vm219_vm0, %v341_v44, 0.0  ;;  %v355_v59 = vsel %vm219_vm0, %v339_v47, 0.0  ;;  %v337_v61 = vmul.f32 %v1908_v49, %v1866_v28 }
  0x5d   : >>> { %359 = vadd.xlane.f32.xlu1 %v358_v52  ;;  %v291_v0 = vadd.f32 %v290_v56, %v272_v53  ;;  %v264_v12 = vmul.f32 %v1837_v22, %v1875_v33  ;;  %v278_v13 = vsel %vm219_vm0, %v262_v54, 0.0  ;;  %v281_v19 = vsel %vm219_vm0, %v263_v57, 0.0 }
  0x5e   : >>> { %v352_v24 = vsel %vm219_vm0, %v338_v60, 0.0  ;;  %v349_v25 = vsel %vm219_vm0, %v337_v61, 0.0  ;;  %v336_v26 = vmul.f32 %v1929_v62, %v1871_v30  ;;  %v335_v35 = vmul.f32 %v1931_v63, %v240_v31 }
  0x5f   : >>> { %v292_v20 = vadd.f32 %v291_v0, %v275_v55  ;;  %v284_v37 = vsel %vm219_vm0, %v264_v12, 0.0  ;;  %v287_v44 = vsel %vm219_vm0, %v265_v14, 0.0 }
  0x60   : >>> { %362 = vadd.xlane.f32.xlu0 %v361_v58  ;;  %v346_v42 = vsel %vm219_vm0, %v336_v26, 0.0  ;;  %v343_v43 = vsel %vm219_vm0, %v335_v35, 0.0 }
  0x61   : >>> { %356 = vadd.xlane.f32.xlu1 %v355_v59  ;;  %v293_v36 = vadd.f32 %v292_v20, %v278_v13 }
  0x63   : >>> { %v294_v41 = vadd.f32 %v293_v36, %v281_v19 }
  0x64   : >>> { %353 = vadd.xlane.f32.xlu0 %v352_v24 }
  0x65   : >>> { %350 = vadd.xlane.f32.xlu1 %v349_v25  ;;  %v295_v47 = vadd.f32 %v294_v41, %v284_v37 }
  0x67   : >>> { %v296_v51 = vadd.f32 %v295_v47, %v287_v44 }
  0x68   : >>> { %347 = vadd.xlane.f32.xlu0 %v346_v42 }
  0x69   : >>> { %344 = vadd.xlane.f32.xlu1 %v343_v43  ;;  %v297_v52 = vrot.slane %v296_v51, 4 }
  0x6b   : >>> { %v298_v54 = vadd.f32 %v297_v52, %v296_v51 }
  0x6c   : >>> { %288 = vadd.xlane.f32.xlu0 %v287_v44 }
  0x6d   : >>> { %v299_v31 = vrot.slane %v298_v54, 2 }
  0x6f   : >>> { %v300_v56 = vadd.f32 %v299_v31, %v298_v54 }
  0x70   : >>> { %285 = vadd.xlane.f32.xlu0 %v284_v37 }
  0x71   : >>> { %v301_v57 = vrot.slane %v300_v56, 1 }
  0x73   : >>> { %v302_v58 = vadd.f32 %v301_v57, %v300_v56 }
  0x74   : >>> { %282 = vadd.xlane.f32.xlu0 %v281_v19 }
  0x75   : >>> { %v310_v59 = vmul.f32 %v302_v58, %v1885_v38  ;;  %v309_v60 = vmul.f32 %v302_v58, %v1889_v40  ;;  %v308_v12 = vmul.f32 %v302_v58, %v1887_v39  ;;  %v307_v20 = vmul.f32 %v302_v58, %v1899_v45 }
  0x76   : >>> { %v306_v24 = vmul.f32 %v302_v58, %v1906_v48  ;;  %v305_v25 = vmul.f32 %v302_v58, %v1908_v49  ;;  %v304_v26 = vmul.f32 %v302_v58, %v1929_v62  ;;  %v303_v35 = vmul.f32 %v302_v58, %v1931_v63 }
  0x77   : >>> { %v332_v61 = vsel %vm219_vm0, %v310_v59, 0.0  ;;  %v329_v0 = vsel %vm219_vm0, %v309_v60, 0.0  ;;  %v326_v14 = vsel %vm219_vm0, %v308_v12, 0.0  ;;  %v323_v19 = vsel %vm219_vm0, %v307_v20, 0.0 }
  0x78   : >>> { %279 = vadd.xlane.f32.xlu0 %v278_v13  ;;  %333 = vadd.xlane.f32.xlu1 %v332_v61  ;;  %v320_v13 = vsel %vm219_vm0, %v306_v24, 0.0 }
  0x7c   : >>> { %276 = vadd.xlane.f32.xlu0 %v275_v55  ;;  %330 = vadd.xlane.f32.xlu1 %v329_v0  ;;  %v317_v55 = vsel %vm219_vm0, %v305_v25, 0.0 }
  0x80   : >>> { %273 = vadd.xlane.f32.xlu0 %v272_v53  ;;  %327 = vadd.xlane.f32.xlu1 %v326_v14  ;;  %v314_v53 = vsel %vm219_vm0, %v304_v26, 0.0 }
  0x84   : >>> { %270 = vadd.xlane.f32.xlu0 %v1902_v46  ;;  %324 = vadd.xlane.f32.xlu1 %v323_v19  ;;  %v311_v46 = vsel %vm219_vm0, %v303_v35, 0.0 }
  0x88   : >>> { %267 = vadd.xlane.f32.xlu0 %v1911_v50  ;;  %321 = vadd.xlane.f32.xlu1 %v320_v13 }
  0x8c   : >>> { %318 = vadd.xlane.f32.xlu1 %v317_v55 }
  0x90   : >>> { %315 = vadd.xlane.f32.xlu1 %v314_v53 }
  0x94   : >>> { %312 = vadd.xlane.f32.xlu1 %v311_v46 }
  0xe5   : >>> { %v1966_v36 = vpop.xlane.xlu0 %365 }
  0xe6   : >>> { %v1970_v41 = vpop.xlane.xlu1 %359  ;;  %v2425_v50 = vand.u32 2147483647, %v1966_v36  ;;  %v390_v43 = vmul.f32 2.0, %v1966_v36 }
  0xe7   : >>> { %v2424_v56 = vand.u32 2147483647, %v1970_v41  ;;  %v388_v59 = vmul.f32 2.0, %v1970_v41 }
  0xe8   : >>> { %vm382_vm9 = vcmp.gt.f32.partialorder %v2425_v50, 0.0 }
  0xe9   : >>> { %v1968_v37 = vpop.xlane.xlu0 %362  ;;  %v398_v52 = vsel %vm382_vm9, %v390_v43, 1.0  ;;  %vm380_vm11 = vcmp.gt.f32.partialorder %v2424_v56, 0.0 }
  0xea   : >>> { %v2422_v44 = vand.u32 2147483647, %v1968_v37  ;;  %v1979_v47 = vpop.xlane.xlu1 %356  ;;  %v389_v54 = vmul.f32 2.0, %v1968_v37  ;;  %1401 = vrcp.f32 %v398_v52  ;;  %v396_v14 = vsel %vm380_vm11, %v388_v59, 1.0 }
  0xeb   : >>> { %v2421_v60 = vand.u32 2147483647, %v1979_v47  ;;  %v387_v0 = vmul.f32 2.0, %v1979_v47 }
  0xec   : >>> { %vm381_vm10 = vcmp.gt.f32.partialorder %v2422_v44, 0.0 }
  0xed   : >>> { %v1973_v42 = vpop.xlane.xlu0 %353  ;;  %v397_v57 = vsel %vm381_vm10, %v389_v54, 1.0  ;;  %vm379_vm12 = vcmp.gt.f32.partialorder %v2421_v60, 0.0 }
  0xee   : >>> { %v1987_v58 = vpop.xlane.xlu1 %350  ;;  %1403 = vrcp.f32 %v397_v57  ;;  %v2420_v20 = vand.u32 2147483647, %v1973_v42  ;;  %v395_v24 = vsel %vm379_vm12, %v387_v0, 1.0  ;;  %v386_v13 = vmul.f32 2.0, %v1973_v42 }
  0xef   : >>> { %1405 = vrcp.f32 %v396_v14  ;;  %v2418_v55 = vand.u32 2147483647, %v1987_v58  ;;  %v385_v43 = vmul.f32 2.0, %v1987_v58 }
  0xf0   : >>> { %vm378_vm13 = vcmp.gt.f32.partialorder %v2420_v20, 0.0  ;;  %1407 = vrcp.f32 %v395_v24 }
  0xf1   : >>> { %v1981_v51 = vpop.xlane.xlu0 %347  ;;  %v394_v46 = vsel %vm378_vm13, %v386_v13, 1.0  ;;  %vm377_vm14 = vcmp.gt.f32.partialorder %v2418_v55, 0.0 }
  0xf2   : >>> { %v1994_v12 = vpop.xlane.xlu1 %344  ;;  %v2419_v59 = vand.u32 2147483647, %v1981_v51  ;;  %1409 = vrcp.f32 %v394_v46  ;;  %v393_v24 = vsel %vm377_vm14, %v385_v43, 1.0  ;;  %v384_v13 = vmul.f32 2.0, %v1981_v51 }
  0xf4   : >>> { %vm2017_vm15 = vcmp.gt.f32.partialorder %v2419_v59, 0.0 }
  0xf5   : >>> { %v289_v31 = vpop.xlane.xlu0 %288 }
  0xf7   : >>> { %v1402_v25 = vpop.eup %1401 }
  0xf9   : >>> { %v286_v61 = vpop.xlane.xlu0 %285 }
  0xfb   : >>> { %v1404_v54 = vpop.eup %1403 }
  0xfc   : >>> { %v1406_v43 = vpop.eup %1405 }
  0xfd   : >>> { %v283_v19 = vpop.xlane.xlu0 %282  ;;  %v1408_v60 = vpop.eup %1407 }
 0x101   : >>> { %v334_v26 = vpop.xlane.xlu1 %333  ;;  %v280_v35 = vpop.xlane.xlu0 %279 }
 0x102   : >>> { %v406_v53 = vsub.f32 %v334_v26, %v289_v31 }
 0x104   : >>> { %v2004_v52 = vmul.f32 %v1402_v25, %v406_v53  ;;  %v2423_v25 = vand.u32 2147483647, %v1994_v12 }
 0x105   : >>> { %v331_v57 = vpop.xlane.xlu1 %330  ;;  %v277_v10 = vpop.xlane.xlu0 %276 }
 0x106   : >>> { %v454_v0 = vmul.f32 %v2004_v52, %v2004_v52  ;;  %v405_v14 = vsub.f32 %v331_v57, %v286_v61  ;;  %v392_v57 = vsel %vm2017_vm15, %v384_v13, 1.0  ;;  %vm375_vm1 = vcmp.gt.f32.partialorder %v2423_v25, 0.0 }
 0x107   : >>> { %vm430_vm10 = vcmp.ge.f32.partialorder %v2004_v52, 0.0 }
 0x108   : >>> { %v462_v31 = vadd.f32 1.0, %v454_v0  ;;  %v2011_v26 = vmul.f32 %v1404_v54, %v405_v14  ;;  %v383_v54 = vmul.f32 2.0, %v1994_v12 }
 0x109   : >>> { %v328_v53 = vpop.xlane.xlu1 %327 }
 0x10a   : >>> { %1411 = vrsqrt.f32 %v462_v31  ;;  %v453_v61 = vmul.f32 %v2011_v26, %v2011_v26  ;;  %v404_v46 = vsub.f32 %v328_v53, %v283_v19  ;;  %v391_v44 = vsel %vm375_vm1, %v383_v54, 1.0 }
 0x10b   : >>> { %1413 = vrcp.f32 %v393_v24  ;;  %v274_v24 = vpop.xlane.xlu0 %273  ;;  %vm514_vm2 = vcmp.eq.f32.partialorder %v462_v31, inf  ;;  %vm516_vm3 = vcmp.eq.f32.partialorder %v462_v31, 0.0  ;;  %vm429_vm14 = vcmp.ge.f32.partialorder %v2011_v26, 0.0 }
 0x10c   : >>> { %v461_v0 = vadd.f32 1.0, %v453_v61  ;;  %v2028_v14 = vmul.f32 %v1406_v43, %v404_v46  ;;  %v1410_v46 = vpop.eup %1409 }
 0x10d   : >>> { %v325_v59 = vpop.xlane.xlu1 %324 }
 0x10e   : >>> { %v403_v20 = vsub.f32 %v325_v59, %v280_v35  ;;  %1415 = vrsqrt.f32 %v461_v0  ;;  %v452_v19 = vmul.f32 %v2028_v14, %v2028_v14  ;;  %vm507_vm4 = vcmp.eq.f32.partialorder %v461_v0, inf }
 0x10f   : >>> { %1417 = vrcp.f32 %v392_v57  ;;  %v271_v54 = vpop.xlane.xlu0 %270  ;;  %vm509_vm5 = vcmp.eq.f32.partialorder %v461_v0, 0.0 }
 0x110   : >>> { %v2032_v53 = vmul.f32 %v1408_v60, %v403_v20  ;;  %v460_v13 = vadd.f32 1.0, %v452_v19  ;;  %1419 = vrcp.f32 %v391_v44  ;;  %v446_v44 = vand.u32 2147483647, %v2004_v52 }
 0x111   : >>> { %v322_v55 = vpop.xlane.xlu1 %321 }
 0x112   : >>> { %v451_v25 = vmul.f32 %v2032_v53, %v2032_v53  ;;  %v402_v61 = vsub.f32 %v322_v55, %v277_v10  ;;  %1421 = vrsqrt.f32 %v460_v13  ;;  %v517_v10 = vand.u32 2147483648, %v462_v31 }
 0x113   : >>> { %vm500_vm6 = vcmp.eq.f32.partialorder %v460_v13, inf  ;;  %vm502_vm7 = vcmp.eq.f32.partialorder %v460_v13, 0.0 }
 0x114   : >>> { %v2036_v35 = vadd.f32 1.0, %v451_v25  ;;  %v2038_v59 = vmul.f32 %v1410_v46, %v402_v61 }
 0x115   : >>> { %v319_v43 = vpop.xlane.xlu1 %318 }
 0x116   : >>> { %v401_v57 = vsub.f32 %v319_v43, %v274_v24  ;;  %1423 = vrsqrt.f32 %v2036_v35  ;;  %v450_v19 = vmul.f32 %v2038_v59, %v2038_v59  ;;  %vm493_vm8 = vcmp.eq.f32.partialorder %v2036_v35, inf }
 0x117   : >>> { %v1412_v56 = vpop.eup %1411  ;;  %vm495_vm9 = vcmp.eq.f32.partialorder %v2036_v35, 0.0  ;;  %v442_v52 = vand.u32 2147483647, %v2038_v59 }
 0x118   : >>> { %v1414_v60 = vpop.eup %1413  ;;  %v513_v20 = vmul.f32 %v1412_v56, %v462_v31  ;;  %v2046_v46 = vadd.f32 1.0, %v450_v19  ;;  %v268_v56 = vpop.xlane.xlu0 %267  ;;  %v445_v19 = vand.u32 2147483647, %v2011_v26 }
 0x119   : >>> { %v2044_v55 = vmul.f32 %v1414_v60, %v401_v57  ;;  %v316_v25 = vpop.xlane.xlu1 %315 }
 0x11a   : >>> { %v515_v61 = vsel %vm514_vm2, %v462_v31, %v513_v20  ;;  %v400_v24 = vsub.f32 %v316_v25, %v271_v54  ;;  %1425 = vrsqrt.f32 %v2046_v46  ;;  %v510_v31 = vand.u32 2147483648, %v461_v0 }
 0x11b   : >>> { %v518_v43 = vsel %vm516_vm3, %v517_v10, %v515_v61  ;;  %v449_v50 = vmul.f32 %v2044_v55, %v2044_v55  ;;  %v1416_v9 = vpop.eup %1415  ;;  %vm486_vm11 = vcmp.eq.f32.partialorder %v2046_v46, inf  ;;  %vm488_vm12 = vcmp.eq.f32.partialorder %v2046_v46, 0.0 }
 0x11c   : >>> { %v526_v8 = vadd.f32 %v518_v43, %v446_v44  ;;  %v1418_v7 = vpop.eup %1417  ;;  %v506_v6 = vmul.f32 %v1416_v9, %v461_v0 }
 0x11d   : >>> { %v2051_v57 = vadd.f32 1.0, %v449_v50  ;;  %v313_v60 = vpop.xlane.xlu1 %312  ;;  %v2053_v20 = vmul.f32 %v1418_v7, %v400_v24  ;;  %v1420_v44 = vpop.eup %1419  ;;  %v503_v7 = vand.u32 2147483648, %v460_v13 }
 0x11e   : >>> { %1427 = vrcp.f32 %v526_v8  ;;  %v399_v54 = vsub.f32 %v313_v60, %v268_v56  ;;  %v508_v10 = vsel %vm507_vm4, %v461_v0, %v506_v6  ;;  %v444_v6 = vand.u32 2147483647, %v2028_v14 }
 0x11f   : >>> { %1429 = vrsqrt.f32 %v2051_v57  ;;  %v511_v25 = vsel %vm509_vm5, %v510_v31, %v508_v10  ;;  %v1422_v61 = vpop.eup %1421  ;;  %v448_v9 = vmul.f32 %v2053_v20, %v2053_v20  ;;  %v496_v10 = vand.u32 2147483648, %v2036_v35 }
 0x120   : >>> { %v525_v43 = vadd.f32 %v511_v25, %v445_v19  ;;  %v2059_v50 = vmul.f32 %v1420_v44, %v399_v54  ;;  %v499_v8 = vmul.f32 %v1422_v61, %v460_v13  ;;  %v443_v25 = vand.u32 2147483647, %v2032_v53 }
 0x121   : >>> { %v2061_v24 = vadd.f32 1.0, %v448_v9  ;;  %vm479_vm15 = vcmp.eq.f32.partialorder %v2051_v57, inf  ;;  %vm481_vm1 = vcmp.eq.f32.partialorder %v2051_v57, 0.0  ;;  %vm428_vm4 = vcmp.ge.f32.partialorder %v2028_v14, 0.0 }
 0x122   : >>> { %1431 = vrcp.f32 %v525_v43  ;;  %v501_v0 = vsel %vm500_vm6, %v460_v13, %v499_v8  ;;  %v447_v60 = vmul.f32 %v2059_v50, %v2059_v50  ;;  %vm427_vm5 = vcmp.ge.f32.partialorder %v2032_v53, 0.0 }
 0x123   : >>> { %v1424_v56 = vpop.eup %1423  ;;  %v504_v31 = vsel %vm502_vm7, %v503_v7, %v501_v0  ;;  %1433 = vrsqrt.f32 %v2061_v24  ;;  %v489_v0 = vand.u32 2147483648, %v2046_v46  ;;  %vm472_vm6 = vcmp.eq.f32.partialorder %v2061_v24, inf }
 0x124   : >>> { %v492_v19 = vmul.f32 %v1424_v56, %v2036_v35  ;;  %v524_v54 = vadd.f32 %v504_v31, %v444_v6  ;;  %v2070_v44 = vadd.f32 1.0, %v447_v60  ;;  %v1610_v56 = vmov -1.0  }
 0x125   : >>> { %v438_v6 = vsel %vm430_vm10, 1.0, %v1610_v56  ;;  %v440_v14 = vand.u32 2147483647, %v2053_v20  ;;  %vm474_vm7 = vcmp.eq.f32.partialorder %v2061_v24, 0.0 }
 0x126   : >>> { %v494_v61 = vsel %vm493_vm8, %v2036_v35, %v492_v19  ;;  %1435 = vrcp.f32 %v524_v54  ;;  %v2447_v19 = vand.u32 2147483647, %v1966_v36  ;;  %vm465_vm8 = vcmp.eq.f32.partialorder %v2070_v44, inf }
 0x127   : >>> { %v497_v13 = vsel %vm495_vm9, %v496_v10, %v494_v61  ;;  %v1426_v43 = vpop.eup %1425  ;;  %1437 = vrsqrt.f32 %v2070_v44  ;;  %v482_v61 = vand.u32 2147483648, %v2051_v57  ;;  %vm467_vm9 = vcmp.eq.f32.partialorder %v2070_v44, 0.0 }
 0x128   : >>> { %v523_v9 = vadd.f32 %v497_v13, %v443_v25  ;;  %v485_v8 = vmul.f32 %v1426_v43, %v2046_v46  ;;  %vm550_vm13 = vcmp.gt.f32.partialorder %v2447_v19, 1e-30  ;;  %v441_v43 = vand.u32 2147483647, %v2044_v55 }
 0x12a   : >>> { %1439 = vrcp.f32 %v523_v9  ;;  %v487_v60 = vsel %vm486_vm11, %v2046_v46, %v485_v8  ;;  %v437_v9 = vsel %vm429_vm14, 1.0, %v1610_v56  ;;  %vm426_vm11 = vcmp.ge.f32.partialorder %v2038_v59, 0.0 }
 0x12b   : >>> { %v1428_v7 = vpop.eup %1427  ;;  %v490_v54 = vsel %vm488_vm12, %v489_v0, %v487_v60  ;;  %vm425_vm12 = vcmp.ge.f32.partialorder %v2044_v55, 0.0 }
 0x12c   : >>> { %v1430_v35 = vpop.eup %1429  ;;  %v542_v31 = vmul.f32 %v1428_v7, %v438_v6  ;;  %v522_v25 = vadd.f32 %v490_v54, %v442_v52  ;;  %v2448_v52 = vand.u32 2147483647, %v1970_v41  ;;  %v475_v41 = vand.u32 2147483648, %v2061_v24 }
 0x12d   : >>> { %v478_v10 = vmul.f32 %v1430_v35, %v2051_v57  ;;  %v433_v59 = vsel %vm425_vm12, 1.0, %v1610_v56 }
 0x12e   : >>> { %v2090_v13 = vsel %vm550_vm13, %v542_v31, 0.0  ;;  %1441 = vrcp.f32 %v522_v25  ;;  %vm2100_vm2 = vcmp.gt.f32.partialorder %v2448_v52, 1e-30 }
 0x12f   : >>> { %v480_v46 = vsel %vm479_vm15, %v2051_v57, %v478_v10  ;;  %v566_v36 = vmul.f32 %v2090_v13, %v2090_v13  ;;  %v1432_v26 = vpop.eup %1431  ;;  %v2451_v57 = vand.u32 2147483647, %v1968_v37  ;;  %v436_v37 = vsel %vm428_vm4, 1.0, %v1610_v56 }
 0x130   : >>> { %v483_v8 = vsel %vm481_vm1, %v482_v61, %v480_v46  ;;  %v540_v7 = vmul.f32 %v1432_v26, %v437_v9  ;;  %v1434_v35 = vpop.eup %1433  ;;  %v439_v9 = vand.u32 2147483647, %v2059_v50  ;;  %vm424_vm15 = vcmp.ge.f32.partialorder %v2053_v20, 0.0 }
 0x131   : >>> { %v521_v6 = vadd.f32 %v483_v8, %v441_v43  ;;  %v574_v0 = vadd.f32 1.0, %v566_v36  ;;  %vm549_vm3 = vcmp.gt.f32.partialorder %v2451_v57, 1e-30  ;;  %v471_v31 = vmul.f32 %v1434_v35, %v2061_v24 }
 0x132   : >>> { %v2109_v19 = vsel %vm549_vm3, %v540_v7, 0.0  ;;  %v435_v43 = vsel %vm427_vm5, 1.0, %v1610_v56  ;;  %v2452_v57 = vand.u32 2147483647, %v1979_v47  ;;  %vm423_vm1 = vcmp.ge.f32.partialorder %v2059_v50, 0.0 }
 0x133   : >>> { %1443 = vrcp.f32 %v521_v6  ;;  %v565_v54 = vmul.f32 %v2109_v19, %v2109_v19  ;;  %v1436_v10 = vpop.eup %1435  ;;  %v473_v53 = vsel %vm472_vm6, %v2061_v24, %v471_v31  ;;  %v468_v6 = vand.u32 2147483648, %v2070_v44 }
 0x134   : >>> { %1445 = vrsqrt.f32 %v574_v0  ;;  %v1438_v25 = vpop.eup %1437  ;;  %v538_v61 = vmul.f32 %v1436_v10, %v436_v37  ;;  %v476_v46 = vsel %vm474_vm7, %v475_v41, %v473_v53  ;;  %vm547_vm10 = vcmp.gt.f32.partialorder %v2452_v57, 1e-30 }
 0x135   : >>> { %v573_v36 = vadd.f32 1.0, %v565_v54  ;;  %v520_v26 = vadd.f32 %v476_v46, %v440_v14  ;;  %v464_v8 = vmul.f32 %v1438_v25, %v2070_v44  ;;  %v434_v53 = vsel %vm426_vm11, 1.0, %v1610_v56 }
 0x136   : >>> { %v556_v24 = vsel %vm2100_vm2, %v538_v61, 0.0  ;;  %v2453_v25 = vand.u32 2147483647, %v1973_v42 }
 0x137   : >>> { %v1440_v7 = vpop.eup %1439  ;;  %1447 = vrsqrt.f32 %v573_v36  ;;  %v466_v35 = vsel %vm465_vm8, %v2070_v44, %v464_v8  ;;  %v564_v52 = vmul.f32 %v556_v24, %v556_v24 }
 0x138   : >>> { %v536_v0 = vmul.f32 %v1440_v7, %v435_v43  ;;  %1449 = vrcp.f32 %v520_v26  ;;  %v469_v31 = vsel %vm467_vm9, %v468_v6, %v466_v35  ;;  %vm546_vm13 = vcmp.gt.f32.partialorder %v2453_v25, 1e-30 }
 0x139   : >>> { %v519_v41 = vadd.f32 %v469_v31, %v439_v9  ;;  %v572_v54 = vadd.f32 1.0, %v564_v52  ;;  %v2454_v26 = vand.u32 2147483647, %v1987_v58  ;;  %v432_v52 = vsel %vm424_vm15, 1.0, %v1610_v56 }
 0x13a   : >>> { %v555_v10 = vsel %vm547_vm10, %v536_v0, 0.0  ;;  %v2456_v25 = vand.u32 2147483647, %v1994_v12 }
 0x13b   : >>> { %v563_v37 = vmul.f32 %v555_v10, %v555_v10  ;;  %v1442_v14 = vpop.eup %1441  ;;  %1451 = vrcp.f32 %v519_v41  ;;  %vm545_vm14 = vcmp.gt.f32.partialorder %v2454_v26, 1e-30 }
 0x13c   : >>> { %v534_v60 = vmul.f32 %v1442_v14, %v434_v53  ;;  %1453 = vrsqrt.f32 %v572_v54  ;;  %v431_v14 = vsel %vm423_vm1, 1.0, %v1610_v56  ;;  %vm543_vm3 = vcmp.gt.f32.partialorder %v2456_v25, 1e-30 }
 0x13d   : >>> { %v571_v44 = vadd.f32 1.0, %v563_v37 }
 0x13e   : >>> { %v554_v61 = vsel %vm546_vm13, %v534_v60, 0.0 }
 0x13f   : >>> { %1455 = vrsqrt.f32 %v571_v44  ;;  %v562_v36 = vmul.f32 %v554_v61, %v554_v61 }
 0x140   : >>> { %v1444_v47 = vpop.eup %1443 }
 0x141   : >>> { %v1446_v43 = vpop.eup %1445  ;;  %v532_v46 = vmul.f32 %v1444_v47, %v433_v59  ;;  %v570_v9 = vadd.f32 1.0, %v562_v36 }
 0x142   : >>> { %v590_v55 = vmul.f32 %v1446_v43, %v2090_v13  ;;  %v2141_v42 = vmul.f32 %v1446_v43, %v1843_v23 }
 0x143   : >>> { %v553_v8 = vsel %vm545_vm14, %v532_v46, 0.0  ;;  %1457 = vrsqrt.f32 %v570_v9 }
 0x144   : >>> { %v2144_v7 = vmul.f32 %v590_v55, %v1885_v38  ;;  %v561_v6 = vmul.f32 %v553_v8, %v553_v8  ;;  %v1448_v0 = vpop.eup %1447  ;;  %v2455_v38 = vand.u32 2147483647, %v1981_v51 }
 0x145   : >>> { %v1450_v35 = vpop.eup %1449  ;;  %v589_v13 = vmul.f32 %v1448_v0, %v2109_v19  ;;  %v2156_v41 = vmul.f32 %v1448_v0, %v1837_v22 }
 0x146   : >>> { %v614_v58 = vadd.f32 %v2144_v7, %v2141_v42  ;;  %v569_v20 = vadd.f32 1.0, %v561_v6  ;;  %v530_v57 = vmul.f32 %v1450_v35, %v432_v52  ;;  %v622_v31 = vsub.f32 %v2141_v42, %v2144_v7 }
 0x147   : >>> { %vm544_vm2 = vcmp.gt.f32.partialorder %v2455_v38, 1e-30  ;;  %v2159_v54 = vmul.f32 %v589_v13, %v1889_v40 }
 0x148   : >>> { %1268 = vmatprep.subr.mxu0 %v614_v58  ;;  %1459 = vrsqrt.f32 %v569_v20  ;;  %v552_v19 = vsel %vm544_vm2, %v530_v57, 0.0  ;;  %v1452_v37 = vpop.eup %1451 }
 0x149   : >>> { %1269 = vmatpush3.msra.mxu0 %v614_v58  ;;  %v613_v50 = vadd.f32 %v2159_v54, %v2156_v41  ;;  %v560_v53 = vmul.f32 %v552_v19, %v552_v19  ;;  %v621_v51 = vsub.f32 %v2156_v41, %v2159_v54  ;;  %v1454_v60 = vpop.eup %1453  ;;  %v528_v44 = vmul.f32 %v1452_v37, %v431_v14 }
 0x14a   : >>> { %v588_v40 = vmul.f32 %v1454_v60, %v556_v24  ;;  %v2169_v56 = vmul.f32 %v1454_v60, %v1831_v21 }
 0x14b   : >>> { %1270 = vmatprep.subr.mxu0 %v613_v50  ;;  %v568_v47 = vadd.f32 1.0, %v560_v53  ;;  %v551_v43 = vsel %vm543_vm3, %v528_v44, 0.0 }
 0x14c   : >>> { %v1456_v59 = vpop.eup %1455  ;;  %1271 = vmatpush3.msra.mxu0 %v613_v50  ;;  %v2172_v46 = vmul.f32 %v588_v40, %v1887_v39  ;;  %v559_v26 = vmul.f32 %v551_v43, %v551_v43 }
 0x14d   : >>> { %v587_v36 = vmul.f32 %v1456_v59, %v555_v10  ;;  %1461 = vrsqrt.f32 %v568_v47  ;;  %v2177_v12 = vmul.f32 %v1456_v59, %v1820_v18 }
 0x14e   : >>> { %v612_v55 = vadd.f32 %v2172_v46, %v2169_v56  ;;  %v620_v9 = vsub.f32 %v2169_v56, %v2172_v46  ;;  %v567_v6 = vadd.f32 1.0, %v559_v26 }
 0x14f   : >>> { %v2180_v24 = vmul.f32 %v587_v36, %v1899_v45 }
 0x150   : >>> { %v1458_v0 = vpop.eup %1457  ;;  %1272 = vmatprep.subr.mxu0 %v612_v55  ;;  %1463 = vrsqrt.f32 %v567_v6 }
 0x151   : >>> { %v611_v39 = vadd.f32 %v2180_v24, %v2177_v12  ;;  %v619_v10 = vsub.f32 %v2177_v12, %v2180_v24  ;;  %1273 = vmatpush3.msra.mxu0 %v612_v55  ;;  %v586_v35 = vmul.f32 %v1458_v0, %v554_v61  ;;  %v2189_v45 = vmul.f32 %v1458_v0, %v1817_v17 }
 0x153   : >>> { %1274 = vmatprep.subr.mxu0 %v611_v39  ;;  %v2192_v58 = vmul.f32 %v586_v35, %v1906_v48 }
 0x154   : >>> { %1275 = vmatpush3.msra.mxu0 %v611_v39 }
 0x155   : >>> { %v1460_v52 = vpop.eup %1459  ;;  %v610_v20 = vadd.f32 %v2192_v58, %v2189_v45  ;;  %v618_v57 = vsub.f32 %v2189_v45, %v2192_v58 }
 0x156   : >>> { %v585_v13 = vmul.f32 %v1460_v52, %v553_v8  ;;  %v593_v38 = vmul.f32 %v1460_v52, %v1814_v16 }
 0x157   : >>> { %1276 = vmatprep.subr.mxu0 %v610_v20 }
 0x158   : >>> { %v601_v61 = vmul.f32 %v585_v13, %v1908_v49  ;;  %1277 = vmatpush3.msra.mxu0 %v610_v20 }
 0x15a   : >>> { %v609_v37 = vadd.f32 %v601_v61, %v593_v38  ;;  %v617_v14 = vsub.f32 %v593_v38, %v601_v61  ;;  %v1462_v50 = vpop.eup %1461 }
 0x15b   : >>> { %v584_v53 = vmul.f32 %v1462_v50, %v552_v19  ;;  %v592_v48 = vmul.f32 %v1462_v50, %v1811_v15 }
 0x15c   : >>> { %1278 = vmatprep.subr.mxu0 %v609_v37 }
 0x15d   : >>> { %1279 = vmatpush3.msra.mxu0 %v609_v37  ;;  %v600_v8 = vmul.f32 %v584_v53, %v1929_v62  ;;  %v1464_v60 = vpop.eup %1463 }
 0x15e   : >>> { %v583_v40 = vmul.f32 %v1464_v60, %v551_v43  ;;  %v591_v49 = vmul.f32 %v1464_v60, %v1805_v11 }
 0x15f   : >>> { %v608_v44 = vadd.f32 %v600_v8, %v592_v48  ;;  %v616_v25 = vsub.f32 %v592_v48, %v600_v8 }
 0x160   : >>> { %v599_v47 = vmul.f32 %v583_v40, %v1931_v63 }
 0x161   : >>> { %1280 = vmatprep.subr.mxu0 %v608_v44 }
 0x162   : >>> { %1281 = vmatpush3.msra.mxu0 %v608_v44  ;;  %v607_v59 = vadd.f32 %v599_v47, %v591_v49  ;;  %v615_v36 = vsub.f32 %v591_v49, %v599_v47 }
 0x164   : >>> { %1282 = vmatprep.subr.mxu0 %v607_v59  ;;  %1312 = vmatprep.mubr.msk.f32.mxu1 %vm219_vm0, %v615_v36 }
 0x165   : >>> { %1283 = vmatpush3.msra.mxu0 %v607_v59 }
 0x166   : >>> { %1285 = vmatmul.mubr.msk.f32.vlgmr.msra.gmra.mxu0 %vm219_vm0, %v1871_v30 }
 0x167   : >>> { %1287 = vmatprep.mubr.msk.f32.mxu0 %vm219_vm0, %v1866_v28 }
 0x16a   : >>> { %1288 = vmatmul.mubr.msk.f32.gmra.mxu0 %vm219_vm0, %v1864_v27 }
 0x16b   : >>> { %1290 = vmatprep.mubr.msk.f32.mxu0 %vm219_vm0, %v1877_v34 }
 0x16e   : >>> { %1291 = vmatmul.mubr.msk.f32.gmra.mxu0 %vm219_vm0, %v1873_v32 }
 0x16f   : >>> { %1293 = vmatprep.mubr.msk.f32.mxu0 %vm219_vm0, %v1875_v33 }
 0x172   : >>> { %1294 = vmatmul.mubr.msk.f32.gmra.mxu0 %vm219_vm0, %v1868_v29 }
 0x226   : >>> { %v1286_v62 = vpop.f32.mrf.mxu0 }
 0x228   : >>> { %v713_v30 = vpop.f32.mrf.mxu0 }
 0x22a   : >>> { %v1289_v63 = vpop.f32.mrf.mxu0 }
 0x22c   : >>> { %v723_v19 = vpop.f32.mrf.mxu0 }
 0x22e   : >>> { %v1292_v28 = vpop.f32.mrf.mxu0 }
 0x230   : >>> { %v733_v43 = vpop.f32.mrf.mxu0 }
 0x232   : >>> { %v1295_v26 = vpop.f32.mrf.mxu0 }
 0x233   : >>> { %1296 = vmatprep.subr.mxu1 %v1295_v26 }
 0x234   : >>> { %v743_v27 = vpop.f32.mrf.mxu0  ;;  %1297 = vmatpush3.msra.mxu1 %v1295_v26 }
 0x235   : >>> { %1298 = vmatprep.subr.mxu1 %v743_v27 }
 0x236   : >>> { %1299 = vmatpush3.msra.mxu1 %v743_v27 }
 0x237   : >>> { %1300 = vmatprep.subr.mxu1 %v1292_v28 }
 0x238   : >>> { %1301 = vmatpush3.msra.mxu1 %v1292_v28 }
 0x239   : >>> { %1302 = vmatprep.subr.mxu1 %v733_v43 }
 0x23a   : >>> { %1303 = vmatpush3.msra.mxu1 %v733_v43 }
 0x23b   : >>> { %1304 = vmatprep.subr.mxu1 %v1289_v63 }
 0x23c   : >>> { %1305 = vmatpush3.msra.mxu1 %v1289_v63 }
 0x23d   : >>> { %1306 = vmatprep.subr.mxu1 %v723_v19 }
 0x23e   : >>> { %1307 = vmatpush3.msra.mxu1 %v723_v19 }
 0x23f   : >>> { %1308 = vmatprep.subr.mxu1 %v1286_v62 }
 0x240   : >>> { %1309 = vmatpush3.msra.mxu1 %v1286_v62 }
 0x241   : >>> { %1310 = vmatprep.subr.mxu1 %v713_v30 }
 0x242   : >>> { %1311 = vmatpush3.msra.mxu1 %v713_v30 }
 0x243   : >>> { %1313 = vmatmul.mubr.msk.f32.vlgmr.msra.gmra.mxu1 %vm219_vm0, %v616_v25 }
 0x244   : >>> { %1315 = vmatprep.mubr.msk.f32.mxu1 %vm219_vm0, %v617_v14 }
 0x247   : >>> { %1316 = vmatmul.mubr.msk.f32.gmra.mxu1 %vm219_vm0, %v618_v57 }
 0x248   : >>> { %1318 = vmatprep.mubr.msk.f32.mxu1 %vm219_vm0, %v619_v10 }
 0x24b   : >>> { %1319 = vmatmul.mubr.msk.f32.gmra.mxu1 %vm219_vm0, %v620_v9 }
 0x24c   : >>> { %1321 = vmatprep.mubr.msk.f32.mxu1 %vm219_vm0, %v621_v51 }
 0x24f   : >>> { %1322 = vmatmul.mubr.msk.f32.gmra.mxu1 %vm219_vm0, %v622_v31 }
 0x303   : >>> { %v1314_v29 = vpop.f32.mrf.mxu1 }
 0x304   : >>> { %882 = vst.msk [vmem:[#allocation2 + $0x8] sm:$0xff] %vm219_vm0, %v1314_v29 }
 0x305   : >>> { %v842_v32 = vpop.f32.mrf.mxu1 }
 0x306   : >>> { %881 = vst.msk [vmem:[#allocation2] sm:$0xff] %vm219_vm0, %v842_v32 }
 0x307   : >>> { %v1317_v33 = vpop.f32.mrf.mxu1 }
 0x308   : >>> { %884 = vst.msk [vmem:[#allocation2 + $0x18] sm:$0xff] %vm219_vm0, %v1317_v33 }
 0x309   : >>> { %v852_v34 = vpop.f32.mrf.mxu1 }
 0x30a   : >>> { %883 = vst.msk [vmem:[#allocation2 + $0x10] sm:$0xff] %vm219_vm0, %v852_v34 }
 0x30b   : >>> { %v1320_v41 = vpop.f32.mrf.mxu1 }
 0x30c   : >>> { %886 = vst.msk [vmem:[#allocation2 + $0x28] sm:$0xff] %vm219_vm0, %v1320_v41 }
 0x30d   : >>> { %v862_v54 = vpop.f32.mrf.mxu1 }
 0x30e   : >>> { %885 = vst.msk [vmem:[#allocation2 + $0x20] sm:$0xff] %vm219_vm0, %v862_v54 }
 0x30f   : >>> { %v1323_v42 = vpop.f32.mrf.mxu1 }
 0x310   : >>> { %888 = vst.msk [vmem:[#allocation2 + $0x38] sm:$0xff] %vm219_vm0, %v1323_v42 }
 0x311   : >>> { %v872_v7 = vpop.f32.mrf.mxu1  ;;  %238 = sbr.rel (!%p236_p8) target bundleno = 86 (0x56), region = 93 }
 0x312   : >>> { %887 = vst.msk [vmem:[#allocation2 + $0x30] sm:$0xff] %vm219_vm0, %v872_v7 }
 0x316   : > { %232 = sbr.rel (!%p230_p3) target bundleno = 85 (0x55), region = 104  ;;  %v889_v31 = vld [vmem:[#allocation2] sm:$0xff] (%p230_p3)  ;;  %v891_v51 = vld [vmem:[#allocation2 + $0x10] sm:$0xff] (%p230_p3)  ;;  %v890_v56 = vld [vmem:[#allocation2 + $0x8] sm:$0xff] (%p230_p3)  ;;  %vm958_vm4 = vcmp.lt.s32.totalorder (%p230_p3), %v1765_v2, %v1763_v1  ;;  %vm960_vm8 = vcmp.lt.s32.totalorder (%p230_p3), %v1765_v2, %v1771_v4  ;;  %vm959_vm12 = vcmp.lt.s32.totalorder (%p230_p3), %v1765_v2, %v1768_v3  ;;  %v2457_v49 = vmov (%p230_p3), 0.0   ;;  %s1232_s18 = sshll.u32 (%p230_p3), %s1648_s13, 4 }
 0x317   : > { %v897_v46 = vmul.f32 (%p230_p3), %v1805_v11, %v889_v31  ;;  %v899_v55 = vmul.f32 (%p230_p3), %v1814_v16, %v891_v51  ;;  %v898_v12 = vmul.f32 (%p230_p3), %v1811_v15, %v890_v56  ;;  %v892_v24 = vld [vmem:[#allocation2 + $0x18] sm:$0xff] (%p230_p3)  ;;  %v893_v6 = vld [vmem:[#allocation2 + $0x20] sm:$0xff] (%p230_p3)  ;;  %v894_v0 = vld [vmem:[#allocation2 + $0x28] sm:$0xff] (%p230_p3)  ;;  %vm961_vm2 = vcmp.lt.s32.totalorder (%p230_p3), %v1765_v2, %v1774_v5  ;;  %s1091_s20 = sshll.u32 (%p230_p3), %s175_s15, 4  ;;  %s1089_s28 = scalar_lea.hbm (%p230_p3), %s2411_s2, %s1232_s18  ;;  %s1092_s20 = int_to_ptr.vmem [resolvable:$true] %s1091_s20 }
 0x318   : > { %v900_v9 = vmul.f32 (%p230_p3), %v1817_v17, %v892_v24  ;;  %v901_v16 = vmul.f32 (%p230_p3), %v1820_v18, %v893_v6  ;;  %v902_v15 = vmul.f32 (%p230_p3), %v1831_v21, %v894_v0  ;;  %v896_v17 = vld [vmem:[#allocation2 + $0x38] sm:$0xff] (%p230_p3)  ;;  %v2458_v62 = vld [vmem:[#allocation12_spill] sm:$0xff] (%p230_p3)  ;;  %v2459_v28 = vld [vmem:[#allocation13_spill] sm:$0xff] (%p230_p3)  ;;  %s1079_s4 = scalar_lea.sflag (%p230_p3), [#allocation5], %s1753_s14  ;;  %s1519_s3 = scalar_lea.vmem (%p230_p3), %s1092_s20, 16 }
 0x319   : > { %v905_v39 = vsel (%p230_p3), %vm219_vm0, %v897_v46, 0.0  ;;  %v911_v10 = vsel (%p230_p3), %vm219_vm0, %v899_v55, 0.0  ;;  %v908_v35 = vsel (%p230_p3), %vm219_vm0, %v898_v12, 0.0  ;;  %v895_v58 = vld [vmem:[#allocation2 + $0x30] sm:$0xff] (%p230_p3)  ;;  %v904_v61 = vmul.f32 (%p230_p3), %v1843_v23, %v896_v17  ;;  %v2461_v41 = vld [vmem:[#allocation15_spill] sm:$0xff] (%p230_p3)  ;;  %p1520_p11 = scmp.ne.s32.totalorder (%p230_p3), %s1092_s20, %s1519_s3  ;;  %p2462_p9 = scmp.ne.s32.totalorder (%p230_p3), %s2435_s30, 0 }
 0x31a   : > { %906 = vadd.xlane.f32.xlu0 (%p230_p3), %v905_v39  ;;  %912 = vadd.xlane.f32.xlu1 (%p230_p3), %v911_v10  ;;  %v929_v52 = vadd.f32 (%p230_p3), %v908_v35, %v905_v39  ;;  %v914_v11 = vsel (%p230_p3), %vm219_vm0, %v900_v9, 0.0  ;;  %v917_v20 = vsel (%p230_p3), %vm219_vm0, %v901_v16, 0.0  ;;  %v920_v57 = vsel (%p230_p3), %vm219_vm0, %v902_v15, 0.0  ;;  %v2460_v27 = vld [vmem:[#allocation14_spill] sm:$0xff] (%p230_p3)  ;;  %s1611_s5 = smov (%p230_p3), [#allocation8]  }
 0x31b   : > { %v903_v38 = vmul.f32 %v1837_v22, %v895_v58  ;;  %v926_v14 = vsel %vm219_vm0, %v904_v61, 0.0  ;;  %v1022_v46 = vcvt.s32.f32 %v1765_v2  ;;  %p1521_p10 = pnand %p1520_p11, %p2462_p9  ;;  %s1523_s13 = sshll.u32 %s1611_s5, 4  ;;  %s1524_s13 = int_to_ptr.vmem [resolvable:$false] %s1523_s13 }
 0x31c   : > { %v930_v45 = vadd.f32 %v929_v52, %v911_v10  ;;  %s1525_s6 = scalar_lea.vmem %s1524_s13, 32  ;;  %p1526_p13 = scmp.lt.s32.totalorder %s1092_s20, %s1524_s13 }
 0x31d   : > { %v923_v21 = vsel %vm219_vm0, %v903_v38, 0.0  ;;  %p1522_p12 = pneg %p1521_p10  ;;  %p1527_p0 = scmp.lt.s32.totalorder %s1525_s6, %s1519_s3 }
 0x31e   : > { %909 = vadd.xlane.f32.xlu0 %v908_v35  ;;  %915 = vadd.xlane.f32.xlu1 %v914_v11  ;;  %v931_v13 = vadd.f32 %v930_v45, %v914_v11 }
 0x31f   : > { %p1528_p5 = por %p1527_p0, %p1526_p13 }
 0x320   : > { %v932_v37 = vadd.f32 %v931_v13, %v917_v20 }
 0x321   : > { %p1529_p2 = pnand %p1528_p5, %p1522_p12 }
 0x322   : > { %918 = vadd.xlane.f32.xlu0 %v917_v20  ;;  %921 = vadd.xlane.f32.xlu1 %v920_v57  ;;  %v933_v18 = vadd.f32 %v932_v37, %v920_v57 }
 0x324   : > { %v934_v50 = vadd.f32 %v933_v18, %v923_v21 }
 0x326   : > { %924 = vadd.xlane.f32.xlu0 %v923_v21  ;;  %927 = vadd.xlane.f32.xlu1 %v926_v14  ;;  %v935_v53 = vadd.f32 %v934_v50, %v926_v14 }
 0x328   : > { %v936_v48 = vrot.slane %v935_v53, 4 }
 0x32a   : > { %v937_v8 = vadd.f32 %v936_v48, %v935_v53 }
 0x32c   : > { %v938_v60 = vrot.slane %v937_v8, 2 }
 0x32e   : > { %v939_v44 = vadd.f32 %v938_v60, %v937_v8 }
 0x330   : > { %v940_v25 = vrot.slane %v939_v44, 1 }
 0x332   : > { %v2268_v22 = vadd.f32 %v940_v25, %v939_v44 }
 0x3a3   : > { %v2272_v23 = vpop.xlane.xlu0 %906  ;;  %v2274_v40 = vpop.xlane.xlu1 %912 }
 0x3a4   : > { %vm942_vm5 = vcmp.gt.f32.partialorder %v2268_v22, %v2272_v23  ;;  %vm950_vm6 = vcmp.eq.f32.partialorder %v2268_v22, %v2272_v23  ;;  %vm952_vm7 = vcmp.eq.f32.partialorder %v2268_v22, %v2274_v40  ;;  %vm944_vm10 = vcmp.gt.f32.partialorder %v2268_v22, %v2274_v40 }
 0x3a5   : > { %vm966_vm9 = vmand %vm950_vm6, %vm958_vm4 }
 0x3a6   : > { %vm974_vm11 = vmor %vm942_vm5, %vm966_vm9 }
 0x3a7   : > { %v2288_v1 = vpop.xlane.xlu0 %909  ;;  %v1216_v47 = vsel %vm974_vm11, 1.0, %v2457_v49  ;;  %v2291_v59 = vpop.xlane.xlu1 %915  ;;  %vm968_vm13 = vmand %vm952_vm7, %vm960_vm8  ;;  %vm962_vm7 = vcmp.lt.s32.totalorder %v1765_v2, %v2458_v62 }
 0x3a8   : > { %v998_v36 = vsel %vm219_vm0, %v1216_v47, 0.0  ;;  %vm943_vm14 = vcmp.gt.f32.partialorder %v2268_v22, %v2288_v1  ;;  %vm951_vm15 = vcmp.eq.f32.partialorder %v2268_v22, %v2288_v1  ;;  %vm976_vm1 = vmor %vm944_vm10, %vm968_vm13  ;;  %vm945_vm4 = vcmp.gt.f32.partialorder %v2268_v22, %v2291_v59 }
 0x3a9   : > { %999 = vadd.xlane.f32.xlu0 %v998_v36  ;;  %vm967_vm3 = vmand %vm951_vm15, %vm959_vm12  ;;  %v1218_v3 = vsel %vm976_vm1, 1.0, %v2457_v49  ;;  %vm953_vm5 = vcmp.eq.f32.partialorder %v2268_v22, %v2291_v59  ;;  %vm963_vm12 = vcmp.lt.s32.totalorder %v1765_v2, %v2459_v28 }
 0x3aa   : > { %vm975_vm6 = vmor %vm943_vm14, %vm967_vm3  ;;  %v1004_v4 = vsel %vm219_vm0, %v1218_v3, 0.0 }
 0x3ab   : > { %v2308_v30 = vpop.xlane.xlu0 %918  ;;  %v1217_v5 = vsel %vm975_vm6, 1.0, %v2457_v49  ;;  %v2311_v63 = vpop.xlane.xlu1 %921  ;;  %vm969_vm8 = vmand %vm953_vm5, %vm961_vm2  ;;  %vm964_vm2 = vcmp.lt.s32.totalorder %v1765_v2, %v2460_v27 }
 0x3ac   : > { %v1001_v19 = vsel %vm219_vm0, %v1217_v5, 0.0  ;;  %vm977_vm9 = vmor %vm945_vm4, %vm969_vm8  ;;  %vm946_vm10 = vcmp.gt.f32.partialorder %v2268_v22, %v2308_v30  ;;  %vm954_vm11 = vcmp.eq.f32.partialorder %v2268_v22, %v2308_v30  ;;  %vm947_vm14 = vcmp.gt.f32.partialorder %v2268_v22, %v2311_v63 }
 0x3ad   : > { %1002 = vadd.xlane.f32.xlu1 %v1001_v19  ;;  %1005 = vadd.xlane.f32.xlu0 %v1004_v4  ;;  %v1219_v43 = vsel %vm977_vm9, 1.0, %v2457_v49  ;;  %vm970_vm13 = vmand %vm954_vm11, %vm962_vm7  ;;  %vm955_vm15 = vcmp.eq.f32.partialorder %v2268_v22, %v2311_v63  ;;  %vm965_vm7 = vcmp.lt.s32.totalorder %v1765_v2, %v2461_v41 }
 0x3ae   : > { %v1007_v26 = vsel %vm219_vm0, %v1219_v43, 0.0  ;;  %vm978_vm1 = vmor %vm946_vm10, %vm970_vm13 }
 0x3af   : > { %v925_v29 = vpop.xlane.xlu0 %924  ;;  %v1220_v32 = vsel %vm978_vm1, 1.0, %v2457_v49  ;;  %v2329_v33 = vpop.xlane.xlu1 %927  ;;  %vm971_vm3 = vmand %vm955_vm15, %vm963_vm12 }
 0x3b0   : > { %v1010_v34 = vsel %vm219_vm0, %v1220_v32, 0.0  ;;  %vm979_vm4 = vmor %vm947_vm14, %vm971_vm3  ;;  %vm948_vm5 = vcmp.gt.f32.partialorder %v2268_v22, %v925_v29  ;;  %vm956_vm6 = vcmp.eq.f32.partialorder %v2268_v22, %v925_v29  ;;  %vm949_vm9 = vcmp.gt.f32.partialorder %v2268_v22, %v2329_v33 }
 0x3b1   : > { %1008 = vadd.xlane.f32.xlu1 %v1007_v26  ;;  %1011 = vadd.xlane.f32.xlu0 %v1010_v34  ;;  %v1221_v54 = vsel %vm979_vm4, 1.0, %v2457_v49  ;;  %vm972_vm8 = vmand %vm956_vm6, %vm964_vm2  ;;  %vm957_vm10 = vcmp.eq.f32.partialorder %v2268_v22, %v2329_v33 }
 0x3b2   : > { %v1013_v42 = vsel %vm219_vm0, %v1221_v54, 0.0  ;;  %vm980_vm11 = vmor %vm948_vm5, %vm972_vm8 }
 0x3b3   : > { %v1222_v7 = vsel %vm980_vm11, 1.0, %v2457_v49  ;;  %vm973_vm12 = vmand %vm957_vm10, %vm965_vm7  ;;  %vm1076_vm7 = vcmask 516096  }
 0x3b4   : > { %v1016_v31 = vsel %vm219_vm0, %v1222_v7, 0.0  ;;  %vm981_vm13 = vmor %vm949_vm9, %vm973_vm12 }
 0x3b5   : > { %1014 = vadd.xlane.f32.xlu1 %v1013_v42  ;;  %1017 = vadd.xlane.f32.xlu0 %v1016_v31  ;;  %v1223_v51 = vsel %vm981_vm13, 1.0, %v2457_v49 }
 0x3b6   : > { %v1019_v56 = vsel %vm219_vm0, %v1223_v51, 0.0 }
 0x3b9   : > { %1020 = vadd.xlane.f32.xlu1 %v1019_v56 }
 0x432   : > { %v1000_v55 = vpop.xlane.xlu0 %999 }
 0x433   : > { %vm1023_vm14 = vcmp.eq.f32.partialorder %v1000_v55, %v1022_v46 }
 0x434   : > { %v1224_v12 = vsel %vm1023_vm14, 1.0, %v2457_v49 }
 0x435   : > { %v1047_v6 = vmul.f32 %v1224_v12, %v2272_v23 }
 0x436   : > { %v1003_v24 = vpop.xlane.xlu1 %1002  ;;  %v1006_v9 = vpop.xlane.xlu0 %1005 }
 0x437   : > { %vm1024_vm15 = vcmp.eq.f32.partialorder %v1003_v24, %v1022_v46  ;;  %vm1025_vm1 = vcmp.eq.f32.partialorder %v1006_v9, %v1022_v46  ;;  %v1055_v11 = vsel %vm219_vm0, %v1047_v6, 0.0 }
 0x438   : > { %v1225_v0 = vsel %vm1024_vm15, 1.0, %v2457_v49  ;;  %v1226_v39 = vsel %vm1025_vm1, 1.0, %v2457_v49 }
 0x439   : > { %v1048_v10 = vmul.f32 %v1225_v0, %v2288_v1  ;;  %v1049_v35 = vmul.f32 %v1226_v39, %v2274_v40 }
 0x43a   : > { %v1009_v52 = vpop.xlane.xlu1 %1008  ;;  %v1012_v2 = vpop.xlane.xlu0 %1011 }
 0x43b   : > { %v1056_v16 = vsel %vm219_vm0, %v1048_v10, 0.0  ;;  %vm1026_vm2 = vcmp.eq.f32.partialorder %v1009_v52, %v1022_v46  ;;  %vm1027_vm3 = vcmp.eq.f32.partialorder %v1012_v2, %v1022_v46  ;;  %v1058_v17 = vsel %vm219_vm0, %v1049_v35, 0.0 }
 0x43c   : > { %v1057_v15 = vadd.f32 %v1056_v16, %v1055_v11  ;;  %v1227_v45 = vsel %vm1026_vm2, 1.0, %v2457_v49  ;;  %v1228_v58 = vsel %vm1027_vm3, 1.0, %v2457_v49 }
 0x43d   : > { %v1050_v13 = vmul.f32 %v1227_v45, %v2291_v59  ;;  %v1051_v20 = vmul.f32 %v1228_v58, %v2308_v30 }
 0x43e   : > { %v1059_v57 = vadd.f32 %v1058_v17, %v1057_v15  ;;  %v1015_v38 = vpop.xlane.xlu1 %1014  ;;  %v1018_v61 = vpop.xlane.xlu0 %1017 }
 0x43f   : > { %v1060_v37 = vsel %vm219_vm0, %v1050_v13, 0.0  ;;  %vm1028_vm4 = vcmp.eq.f32.partialorder %v1015_v38, %v1022_v46  ;;  %vm1029_vm5 = vcmp.eq.f32.partialorder %v1018_v61, %v1022_v46  ;;  %v1062_v50 = vsel %vm219_vm0, %v1051_v20, 0.0 }
 0x440   : > { %v1061_v18 = vadd.f32 %v1060_v37, %v1059_v57  ;;  %v1229_v21 = vsel %vm1028_vm4, 1.0, %v2457_v49  ;;  %v1230_v14 = vsel %vm1029_vm5, 1.0, %v2457_v49 }
 0x441   : > { %v1052_v53 = vmul.f32 %v1229_v21, %v2311_v63  ;;  %v1053_v48 = vmul.f32 %v1230_v14, %v925_v29 }
 0x442   : > { %v1063_v8 = vadd.f32 %v1062_v50, %v1061_v18  ;;  %v1021_v60 = vpop.xlane.xlu1 %1020 }
 0x443   : > { %v1064_v44 = vsel %vm219_vm0, %v1052_v53, 0.0  ;;  %vm1030_vm6 = vcmp.eq.f32.partialorder %v1021_v60, %v1022_v46  ;;  %v1066_v23 = vsel %vm219_vm0, %v1053_v48, 0.0 }
 0x444   : > { %v1065_v25 = vadd.f32 %v1064_v44, %v1063_v8  ;;  %v1231_v22 = vsel %vm1030_vm6, 1.0, %v2457_v49 }
 0x445   : > { %v1054_v40 = vmul.f32 %v1231_v22, %v2329_v33 }
 0x446   : > { %v1067_v1 = vadd.f32 %v1066_v23, %v1065_v25 }
 0x447   : > { %v1068_v47 = vsel %vm219_vm0, %v1054_v40, 0.0 }
 0x448   : > { %v1069_v59 = vadd.f32 %v1068_v47, %v1067_v1 }
 0x44a   : > { %v1070_v36 = vrot.slane %v1069_v59, 4 }
 0x44c   : > { %v1071_v3 = vadd.f32 %v1070_v36, %v1069_v59 }
 0x44e   : > { %v1072_v4 = vrot.slane %v1071_v3, 2 }
 0x450   : > { %v1073_v62 = vadd.f32 %v1072_v4, %v1071_v3 }
 0x452   : > { %v1074_v30 = vrot.slane %v1073_v62, 1 }
 0x454   : > { %v1075_v49 = vadd.f32 %v1074_v30, %v1073_v62 }
 0x456   : > { %1077 = vst.msk [vmem:[%s175_s15] sm:$0x1] %vm1076_vm7, %v1075_v49 }
 0x457   : > { %1532 = shalt.err (!%p1529_p2)
}
 0x458   : > { %s1533_s7 = scalar_lea.hbm %s1089_s28, 16  ;;  %s1537_s22 = scalar_lea.hbm %s2411_s2, 32 }
 0x459   : > { %p1534_p1 = scmp.ne.s32.totalorder %s1089_s28, %s1533_s7  ;;  %p1538_p4 = scmp.lt.s32.totalorder %s1089_s28, %s2411_s2 }
 0x45a   : > { %p1539_p8 = scmp.lt.s32.totalorder %s1537_s22, %s1533_s7 }
 0x45b   : > { %p1535_p6 = pnand %p1534_p1, %p2462_p9 }
 0x45c   : > { %p1540_p3 = por %p1539_p8, %p1538_p4 }
 0x45d   : > { %p1536_p7 = pneg %p1535_p6 }
 0x45f   : > { %p1541_p11 = pnand %p1540_p3, %p1536_p7 }
 0x461   : > { %1544 = shalt.err (!%p1541_p11)
}
 0x462   : > { %1330 = dma.vmem_to_hbm [thread:$0]  (%p2462_p9), %s1092_s20, 16, %s1089_s28, %s1079_s4  }
 0x463 PF: > { %s1103_s17 = sand.u32 1, %s1583_s9   ;;  %p2463_p10 = scmp.ne.s32.totalorder %s2431_s16, 0 }
 0x464   : > { %p2464_p12 = scmp.ge.s32.totalorder %s1595_s12, 2  ;;  %s1104_s25 = scalar_lea.sflag [#allocation5], %s1103_s17 }
 0x466   : > { %p1341_p13 = pnand %p2464_p12, %p2463_p10 }
 0x468   : > { %p1342_p0 = pneg %p1341_p13 }
 0x46a   : > { %1578 = dma.done.wait (%p1342_p0), %s1104_s25, 16  }
 0x46b   : > { %1580 = vsyncadd (%p1342_p0), %s1104_s25, 4294967280  ;;  %p16_p5 = scmp.ge.s32.totalorder %s1681_s21, 4   ;;  %s2465_s9 = smov %s1587_s10 }
 0x46c   : > { %s2466_s10 = smov %s1591_s11  ;;  %s2467_s11 = smov %s1701_s29 }
 0x46d   : > { %s2468_s12 = smov %s1681_s21  ;;  %18 = sbr.rel (!%p16_p5) target bundleno = 6 (0x6), region = 115 }
 0x472   :  { %1108 = vsyncpa [#allocation4], 1 }
 0x473   :  { %1110 = vsyncpa [#allocation4 + $0x1], 1 }
 0x474   :  { %1111 = vsyncpa [#allocation7], 1 }
 0x475   :  { %1113 = vsyncpa [#allocation7 + $0x1], 1 }
 0x476   :  { %1114 = vsyncpa [#allocation5], 1 }
 0x477   :  { %1116 = vsyncpa [#allocation5 + $0x1], 1 }

</bundles_post_ra>
